<compile_context>
chip_gen: v7x
topology: tpu7x:2x2x1
jax: 0.10.0
libtpu: 0.0.40
codegen_flags: <defaults>
</compile_context>

<pallas_src>
import jax
import jax.numpy as jnp
from jax.experimental import pallas as pl
from jax.experimental.pallas import tpu as pltpu


# ----------------------------------------------------------------------------
# Small compatibility helpers (older JAX spells some symbols differently).
# ----------------------------------------------------------------------------

def _tpu_compiler_params(**kwargs):
    cls = getattr(pltpu, "CompilerParams", None) or getattr(pltpu, "TPUCompilerParams", None)
    if cls is None:
        return None
    return cls(**kwargs)


def _cost_estimate(flops, bytes_accessed):
    ce = getattr(pl, "CostEstimate", None)
    if ce is None:
        return None
    return ce(flops=flops, transcendentals=0, bytes_accessed=bytes_accessed)


def _pallas_call(kernel, *, cost_estimate=None, **kwargs):
    if cost_estimate is not None:
        try:
            return pl.pallas_call(kernel, cost_estimate=cost_estimate, **kwargs)
        except TypeError:   # cost_estimate kwarg not available
            pass
    return pl.pallas_call(kernel, **kwargs)


# ----------------------------------------------------------------------------
# Fused conv1 -> conv2 -> conv3 kernel (one NHWC image per grid step).
# ----------------------------------------------------------------------------

def _conv_stack_kernel(x_ref, w1_ref, w2_ref, w3_ref,
                       b1_ref, b2_ref, b3_ref,
                       s1_ref, s2_ref, s3_ref,
                       o_ref, a1_ref, a2_ref):
    """Runs conv1/conv2/conv3 (k=3, stride=2, ReLU) for one image.

    x_ref  : (1, 64, 64, Cin) f32   NHWC input image
    w*_ref : (9, Cin, Cout)   bf16  conv taps, tap index = kh*3 + kw
    b*_ref : (1, Cout)        f32   biases
    s*_ref : (Wn, W-2)        f32   constant 0/1 stride-2 column selector
    o_ref  : (1, 7, 7, 64)    bf16  conv3 output (NHWC)
    a1_ref : (31, 31, 32)     f32   VMEM scratch, conv1 activations
    a2_ref : (15, 15, 64)     f32   VMEM scratch, conv2 activations
    """

    def conv_layer(load_row, store_row, w_ref, b_ref, s_ref, h, w, cout):
        hn = (h - 3) // 2 + 1       # output height (stride 2, no padding)
        ws = w - 2                  # stride-1 row width
        sel = s_ref[...]            # (wn, ws), sel[n, 2n] = 1
        bias = b_ref[...]           # (1, cout)

        def body(i, carry):
            # 9 taps of output row i, all stride-1 column positions, f32 acc.
            acc = jnp.zeros((ws, cout), jnp.float32)
            for kh in range(3):
                for kw in range(3):
                    lhs = load_row(2 * i + kh, kw, ws).astype(jnp.bfloat16)
                    acc = acc + jnp.dot(lhs, w_ref[kh * 3 + kw],
                                        preferred_element_type=jnp.float32)
            # Stride-2 column selection as a tiny constant matmul (avoids
            # strided loads), then bias + ReLU in f32.
            out = jnp.dot(sel, acc, preferred_element_type=jnp.float32)
            out = jnp.maximum(out + bias, 0.0)
            store_row(i, out)
            return carry

        jax.lax.fori_loop(0, hn, body, 0)

    def load_x(r, kw, n):
        return x_ref[0, r, pl.ds(kw, n), :]

    def load_a1(r, kw, n):
        return a1_ref[r, pl.ds(kw, n), :]

    def load_a2(r, kw, n):
        return a2_ref[r, pl.ds(kw, n), :]

    def store_a1(i, v):
        a1_ref[i, :, :] = v

    def store_a2(i, v):
        a2_ref[i, :, :] = v

    def store_out(i, v):
        o_ref[0, i, :, :] = v.astype(o_ref.dtype)

    conv_layer(load_x,  store_a1,  w1_ref, b1_ref, s1_ref, 64, 64, 32)
    conv_layer(load_a1, store_a2,  w2_ref, b2_ref, s2_ref, 31, 31, 64)
    conv_layer(load_a2, store_out, w3_ref, b3_ref, s3_ref, 15, 15, 64)


def _stride2_col_selector(w_in):
    """(Wn, W-2) f32 matrix with S[n, 2n] = 1 (picks every other column)."""
    wn = (w_in - 3) // 2 + 1
    ws = w_in - 2
    rows = 2 * jnp.arange(wn, dtype=jnp.int32)[:, None]
    cols = jnp.arange(ws, dtype=jnp.int32)[None, :]
    return (rows == cols).astype(jnp.float32)


def conv_stack_forward(x_nhwc, params):
    """(B, 64, 64, Cin) f32 NHWC -> (B, 7, 7, 64) bf16 (conv3 + ReLU output)."""
    b, h, w, cin = x_nhwc.shape
    assert (h, w) == (64, 64), "fc1 = Linear(64*7*7, .) requires 64x64 inputs"

    sel1 = _stride2_col_selector(64)    # (31, 62)
    sel2 = _stride2_col_selector(31)    # (15, 29)
    sel3 = _stride2_col_selector(15)    # (7, 13)

    def _layer_flops(hi, wi, ci, co):
        hn, ws, wn = (hi - 3) // 2 + 1, wi - 2, (wi - 3) // 2 + 1
        return 2 * hn * (9 * ws * ci * co + wn * ws * co)

    flops = b * (_layer_flops(64, 64, cin, 32)
                 + _layer_flops(31, 31, 32, 64)
                 + _layer_flops(15, 15, 64, 64))
    bytes_accessed = (x_nhwc.size * 4
                      + 9 * (cin * 32 + 32 * 64 + 64 * 64) * 2
                      + b * 7 * 7 * 64 * 2)

    return _pallas_call(
        _conv_stack_kernel,
        out_shape=jax.ShapeDtypeStruct((b, 7, 7, 64), jnp.bfloat16),
        grid=(b,),
        in_specs=[
            pl.BlockSpec((1, 64, 64, cin), lambda i: (i, 0, 0, 0)),   # image
            pl.BlockSpec((9, cin, 32), lambda i: (0, 0, 0)),          # conv1 w
            pl.BlockSpec((9, 32, 64), lambda i: (0, 0, 0)),           # conv2 w
            pl.BlockSpec((9, 64, 64), lambda i: (0, 0, 0)),           # conv3 w
            pl.BlockSpec((1, 32), lambda i: (0, 0)),                  # conv1 b
            pl.BlockSpec((1, 64), lambda i: (0, 0)),                  # conv2 b
            pl.BlockSpec((1, 64), lambda i: (0, 0)),                  # conv3 b
            pl.BlockSpec((31, 62), lambda i: (0, 0)),                 # selector 1
            pl.BlockSpec((15, 29), lambda i: (0, 0)),                 # selector 2
            pl.BlockSpec((7, 13), lambda i: (0, 0)),                  # selector 3
        ],
        out_specs=pl.BlockSpec((1, 7, 7, 64), lambda i: (i, 0, 0, 0)),
        scratch_shapes=[
            pltpu.VMEM((31, 31, 32), jnp.float32),   # conv1 activations (VMEM only)
            pltpu.VMEM((15, 15, 64), jnp.float32),   # conv2 activations (VMEM only)
        ],
        compiler_params=_tpu_compiler_params(dimension_semantics=("parallel",)),
        cost_estimate=_cost_estimate(flops, bytes_accessed),
    )(x_nhwc,
      params["conv1_w"], params["conv2_w"], params["conv3_w"],
      params["conv1_b"], params["conv2_b"], params["conv3_b"],
      sel1, sel2, sel3)


# ----------------------------------------------------------------------------
# fc1: fused matmul + bias + ReLU.
# ----------------------------------------------------------------------------

def _fc_kernel(x_ref, w_ref, b_ref, o_ref):
    acc = jnp.dot(x_ref[...], w_ref[...], preferred_element_type=jnp.float32)
    o_ref[...] = jnp.maximum(acc + b_ref[...], 0.0)


def fc_forward(x_bf16, w_bf16, b_f32):
    m, k = x_bf16.shape
    n = w_bf16.shape[1]
    return _pallas_call(
        _fc_kernel,
        out_shape=jax.ShapeDtypeStruct((m, n), jnp.float32),
        grid=(1,),
        in_specs=[pl.BlockSpec((m, k), lambda i: (0, 0)),
                  pl.BlockSpec((k, n), lambda i: (0, 0)),
                  pl.BlockSpec((1, n), lambda i: (0, 0))],
        out_specs=pl.BlockSpec((m, n), lambda i: (0, 0)),
        cost_estimate=_cost_estimate(2 * m * k * n,
                                     m * k * 2 + k * n * 2 + m * n * 4),
    )(x_bf16, w_bf16, b_f32)


# ----------------------------------------------------------------------------
# Parameters (PyTorch-style init, packed once into kernel-ready layouts).
# ----------------------------------------------------------------------------

def _uniform(key, shape, bound):
    return jax.random.uniform(key, shape, jnp.float32, -bound, bound)


def _pack_conv_weight(w):
    # PyTorch (out_c, in_c, 3, 3) -> (9, in_c, out_c), tap index = kh*3 + kw.
    out_c, in_c = w.shape[0], w.shape[1]
    return jnp.transpose(w, (2, 3, 1, 0)).reshape(9, in_c, out_c).astype(jnp.bfloat16)


def _pack_fc_weight(w, hidden_dim):
    # PyTorch Linear weight (hidden, 64*7*7) indexes its input as the NCHW
    # flatten c*49 + h*7 + w.  Our conv stack emits NHWC features flattened as
    # (h*7 + w)*64 + c, so permute the columns once here and transpose.
    wp = w.reshape(hidden_dim, 64, 7, 7).transpose(2, 3, 1, 0)
    return wp.reshape(7 * 7 * 64, hidden_dim).astype(jnp.bfloat16)


def init_params(key, input_channels, hidden_dim):
    ks = jax.random.split(key, 8)

    def conv_init(kw_key, kb_key, out_c, in_c):
        fan_in = in_c * 9
        bound = 1.0 / (fan_in ** 0.5)
        w = _uniform(kw_key, (out_c, in_c, 3, 3), bound)
        bias = _uniform(kb_key, (out_c,), bound)
        return _pack_conv_weight(w), bias.reshape(1, out_c)

    c1w, c1b = conv_init(ks[0], ks[1], 32, input_channels)
    c2w, c2b = conv_init(ks[2], ks[3], 64, 32)
    c3w, c3b = conv_init(ks[4], ks[5], 64, 64)

    fc_in = 64 * 7 * 7
    fb = 1.0 / (fc_in ** 0.5)
    f1w = _uniform(ks[6], (hidden_dim, fc_in), fb)   # PyTorch Linear layout
    f1b = _uniform(ks[7], (hidden_dim,), fb)
    return dict(conv1_w=c1w, conv1_b=c1b,
                conv2_w=c2w, conv2_b=c2b,
                conv3_w=c3w, conv3_b=c3b,
                fc1_w=_pack_fc_weight(f1w, hidden_dim),
                fc1_b=f1b.reshape(1, hidden_dim))


# ----------------------------------------------------------------------------
# Forward pass (matches the PyTorch module's semantics).
# ----------------------------------------------------------------------------

def state_representation_forward(params, state):
    # state: (B, input_channels, 64, 64), NCHW as in PyTorch.
    b = state.shape[0]
    x_nhwc = jnp.transpose(state, (0, 2, 3, 1)).astype(jnp.float32)  # one cheap layout op
    feats = conv_stack_forward(x_nhwc, params)                       # (B, 7, 7, 64) bf16
    x_flat = feats.reshape(b, 7 * 7 * 64)                            # free row-major collapse
    return fc_forward(x_flat, params["fc1_w"], params["fc1_b"])      # (B, hidden) f32


# ----------------------------------------------------------------------------
# Main
# ----------------------------------------------------------------------------

if __name__ == "__main__":
    key = jax.random.PRNGKey(0)
    k_param, k_x = jax.random.split(key)

    batch = 2
    input_channels = 4
    hidden_dim = 32
    # Spatial size must be 64x64 so that three stride-2 k=3 convs yield 7x7
    # (fc1 = Linear(64*7*7, hidden_dim) in the PyTorch module).
    state = jax.random.normal(k_x, (batch, input_channels, 64, 64), jnp.float32)

    params = init_params(k_param, input_channels, hidden_dim)

    out = jax.jit(state_representation_forward)(params, state)
    out = jax.block_until_ready(out)

    assert out.shape == (batch, hidden_dim), out.shape
    assert out.dtype == jnp.float32
    print("KERNEL_OK")
</pallas_src>

<mosaic_0001>
module attributes {stable_mosaic.version = 11 : i64} {
  func.func @_fc_kernel(%arg0: i32, %arg1: memref<2x3136xbf16, #tpu.memory_space<vmem>>, %arg2: memref<3136x32xbf16, #tpu.memory_space<vmem>>, %arg3: memref<1x32xf32, #tpu.memory_space<vmem>>, %arg4: memref<2x32xf32, #tpu.memory_space<vmem>>) attributes {dimension_semantics = [#tpu.dimension_semantics<arbitrary>], iteration_bounds = array<i64: 1>, scalar_prefetch = 0 : i64, scratch_operands = 0 : i64, tpu.core_type = #tpu.core_type<tc>, window_params = [{pipeline_mode = #tpu.pipeline_mode<synchronous>, transform_indices = @transform_0, window_bounds = array<i64: 2, 3136>}, {pipeline_mode = #tpu.pipeline_mode<synchronous>, transform_indices = @transform_1, window_bounds = array<i64: 3136, 32>}, {pipeline_mode = #tpu.pipeline_mode<synchronous>, transform_indices = @transform_2, window_bounds = array<i64: 1, 32>}, {pipeline_mode = #tpu.pipeline_mode<synchronous>, transform_indices = @transform_3, window_bounds = array<i64: 2, 32>}]} {
    %c0 = arith.constant 0 : index
    %c0_0 = arith.constant 0 : index
    %0 = vector.load %arg1[%c0, %c0_0] : memref<2x3136xbf16, #tpu.memory_space<vmem>>, vector<2x3136xbf16>
    %c0_1 = arith.constant 0 : index
    %c0_2 = arith.constant 0 : index
    %1 = vector.load %arg2[%c0_1, %c0_2] : memref<3136x32xbf16, #tpu.memory_space<vmem>>, vector<3136x32xbf16>
    %cst = arith.constant dense<0.000000e+00> : vector<2x32xf32>
    %2 = tpu.matmul %0, %1, %cst {dimension_numbers = #tpu.dot_dimension_numbers<[1], [0], [0], [1], [0, 0, 1, 1], [], []>} : vector<2x3136xbf16>, vector<3136x32xbf16>, vector<2x32xf32> -> vector<2x32xf32>
    %c0_3 = arith.constant 0 : index
    %c0_4 = arith.constant 0 : index
    %3 = vector.load %arg3[%c0_3, %c0_4] : memref<1x32xf32, #tpu.memory_space<vmem>>, vector<1x32xf32>
    %4 = vector.broadcast %3 : vector<1x32xf32> to vector<2x32xf32>
    %5 = arith.addf %2, %4 : vector<2x32xf32>
    %cst_5 = arith.constant 0.000000e+00 : f32
    %6 = vector.broadcast %cst_5 : f32 to vector<2x32xf32>
    %7 = arith.maximumf %5, %6 : vector<2x32xf32>
    %c0_6 = arith.constant 0 : index
    %c0_7 = arith.constant 0 : index
    %8 = vector.load %arg4[%c0_6, %c0_7] : memref<2x32xf32, #tpu.memory_space<vmem>>, vector<2x32xf32>
    tpu.vector_store %arg4[%c0_6, %c0_7], %7 {strides = array<i32>} : memref<2x32xf32, #tpu.memory_space<vmem>>, vector<2x32xf32>,
    return
  }
  func.func @transform_0(%arg0: i32) -> (i32, i32) {
    %c0_i32 = arith.constant 0 : i32
    %c0_i32_0 = arith.constant 0 : i32
    %c0_i32_1 = arith.constant 0 : i32
    return %c0_i32, %c0_i32_0 : i32, i32
  }
  func.func @transform_1(%arg0: i32) -> (i32, i32) {
    %c0_i32 = arith.constant 0 : i32
    %c0_i32_0 = arith.constant 0 : i32
    %c0_i32_1 = arith.constant 0 : i32
    return %c0_i32, %c0_i32_0 : i32, i32
  }
  func.func @transform_2(%arg0: i32) -> (i32, i32) {
    %c0_i32 = arith.constant 0 : i32
    %c0_i32_0 = arith.constant 0 : i32
    %c0_i32_1 = arith.constant 0 : i32
    return %c0_i32, %c0_i32_0 : i32, i32
  }
  func.func @transform_3(%arg0: i32) -> (i32, i32) {
    %c0_i32 = arith.constant 0 : i32
    %c0_i32_0 = arith.constant 0 : i32
    %c0_i32_1 = arith.constant 0 : i32
    return %c0_i32, %c0_i32_0 : i32, i32
  }
}

module attributes {stable_mosaic.version = 11 : i64} {
  func.func @_conv_stack_kernel(%arg0: i32, %arg1: memref<1x64x64x4xf32, #tpu.memory_space<vmem>>, %arg2: memref<9x4x32xbf16, #tpu.memory_space<vmem>>, %arg3: memref<9x32x64xbf16, #tpu.memory_space<vmem>>, %arg4: memref<9x64x64xbf16, #tpu.memory_space<vmem>>, %arg5: memref<1x32xf32, #tpu.memory_space<vmem>>, %arg6: memref<1x64xf32, #tpu.memory_space<vmem>>, %arg7: memref<1x64xf32, #tpu.memory_space<vmem>>, %arg8: memref<31x62xf32, #tpu.memory_space<vmem>>, %arg9: memref<15x29xf32, #tpu.memory_space<vmem>>, %arg10: memref<7x13xf32, #tpu.memory_space<vmem>>, %arg11: memref<1x7x7x64xbf16, #tpu.memory_space<vmem>>, %arg12: memref<31x31x32xf32, #tpu.memory_space<vmem>>, %arg13: memref<15x15x64xf32, #tpu.memory_space<vmem>>) attributes {dimension_semantics = [#tpu.dimension_semantics<parallel>], iteration_bounds = array<i64: 2>, scalar_prefetch = 0 : i64, scratch_operands = 2 : i64, tpu.core_type = #tpu.core_type<tc>, window_params = [{transform_indices = @transform_0, window_bounds = array<i64: 1, 64, 64, 4>}, {pipeline_mode = #tpu.pipeline_mode<synchronous>, transform_indices = @transform_1, window_bounds = array<i64: 9, 4, 32>}, {pipeline_mode = #tpu.pipeline_mode<synchronous>, transform_indices = @transform_2, window_bounds = array<i64: 9, 32, 64>}, {pipeline_mode = #tpu.pipeline_mode<synchronous>, transform_indices = @transform_3, window_bounds = array<i64: 9, 64, 64>}, {pipeline_mode = #tpu.pipeline_mode<synchronous>, transform_indices = @transform_4, window_bounds = array<i64: 1, 32>}, {pipeline_mode = #tpu.pipeline_mode<synchronous>, transform_indices = @transform_5, window_bounds = array<i64: 1, 64>}, {pipeline_mode = #tpu.pipeline_mode<synchronous>, transform_indices = @transform_6, window_bounds = array<i64: 1, 64>}, {pipeline_mode = #tpu.pipeline_mode<synchronous>, transform_indices = @transform_7, window_bounds = array<i64: 31, 62>}, {pipeline_mode = #tpu.pipeline_mode<synchronous>, transform_indices = @transform_8, window_bounds = array<i64: 15, 29>}, {pipeline_mode = #tpu.pipeline_mode<synchronous>, transform_indices = @transform_9, window_bounds = array<i64: 7, 13>}, {transform_indices = @transform_10, window_bounds = array<i64: 1, 7, 7, 64>}]} {
    %c0 = arith.constant 0 : index
    %c0_0 = arith.constant 0 : index
    %0 = vector.load %arg8[%c0, %c0_0] : memref<31x62xf32, #tpu.memory_space<vmem>>, vector<31x62xf32>
    %c0_1 = arith.constant 0 : index
    %c0_2 = arith.constant 0 : index
    %1 = vector.load %arg5[%c0_1, %c0_2] : memref<1x32xf32, #tpu.memory_space<vmem>>, vector<1x32xf32>
    %c0_i32 = arith.constant 0 : i32
    %c31_i32 = arith.constant 31 : i32
    %2 = arith.addi %c0_i32, %c31_i32 : i32
    %c1_i32 = arith.constant 1 : i32
    scf.for %arg14 = %c0_i32 to %2 step %c1_i32  : i32 {
      %cst = arith.constant 0.000000e+00 : f32
      %9 = vector.broadcast %cst : f32 to vector<62x32xf32>
      %c2_i32 = arith.constant 2 : i32
      %10 = arith.muli %c2_i32, %arg14 : i32
      %c0_i32_18 = arith.constant 0 : i32
      %11 = arith.addi %10, %c0_i32_18 : i32
      %c0_19 = arith.constant 0 : index
      %12 = arith.index_cast %11 : i32 to index
      %c0_20 = arith.constant 0 : index
      %c0_21 = arith.constant 0 : index
      %13 = vector.load %arg1[%c0_19, %12, %c0_20, %c0_21] : memref<1x64x64x4xf32, #tpu.memory_space<vmem>>, vector<1x1x62x4xf32>
      %14 = vector.shape_cast %13 : vector<1x1x62x4xf32> to vector<62x4xf32>
      %15 = arith.truncf %14 : vector<62x4xf32> to vector<62x4xbf16>
      %c0_22 = arith.constant 0 : index
      %c0_23 = arith.constant 0 : index
      %c0_24 = arith.constant 0 : index
      %16 = vector.load %arg2[%c0_22, %c0_23, %c0_24] : memref<9x4x32xbf16, #tpu.memory_space<vmem>>, vector<1x4x32xbf16>
      %17 = vector.shape_cast %16 : vector<1x4x32xbf16> to vector<4x32xbf16>
      %cst_25 = arith.constant dense<0.000000e+00> : vector<62x32xf32>
      %18 = tpu.matmul %15, %17, %cst_25 {dimension_numbers = #tpu.dot_dimension_numbers<[1], [0], [0], [1], [0, 0, 1, 1], [], []>} : vector<62x4xbf16>, vector<4x32xbf16>, vector<62x32xf32> -> vector<62x32xf32>
      %19 = arith.addf %9, %18 : vector<62x32xf32>
      %c2_i32_26 = arith.constant 2 : i32
      %20 = arith.muli %c2_i32_26, %arg14 : i32
      %c0_i32_27 = arith.constant 0 : i32
      %21 = arith.addi %20, %c0_i32_27 : i32
      %c0_28 = arith.constant 0 : index
      %22 = arith.index_cast %21 : i32 to index
      %c1 = arith.constant 1 : index
      %c0_29 = arith.constant 0 : index
      %23 = vector.load %arg1[%c0_28, %22, %c1, %c0_29] : memref<1x64x64x4xf32, #tpu.memory_space<vmem>>, vector<1x1x62x4xf32>
      %24 = vector.shape_cast %23 : vector<1x1x62x4xf32> to vector<62x4xf32>
      %25 = arith.truncf %24 : vector<62x4xf32> to vector<62x4xbf16>
      %c1_30 = arith.constant 1 : index
      %c0_31 = arith.constant 0 : index
      %c0_32 = arith.constant 0 : index
      %26 = vector.load %arg2[%c1_30, %c0_31, %c0_32] : memref<9x4x32xbf16, #tpu.memory_space<vmem>>, vector<1x4x32xbf16>
      %27 = vector.shape_cast %26 : vector<1x4x32xbf16> to vector<4x32xbf16>
      %cst_33 = arith.constant dense<0.000000e+00> : vector<62x32xf32>
      %28 = tpu.matmul %25, %27, %cst_33 {dimension_numbers = #tpu.dot_dimension_numbers<[1], [0], [0], [1], [0, 0, 1, 1], [], []>} : vector<62x4xbf16>, vector<4x32xbf16>, vector<62x32xf32> -> vector<62x32xf32>
      %29 = arith.addf %19, %28 : vector<62x32xf32>
      %c2_i32_34 = arith.constant 2 : i32
      %30 = arith.muli %c2_i32_34, %arg14 : i32
      %c0_i32_35 = arith.constant 0 : i32
      %31 = arith.addi %30, %c0_i32_35 : i32
      %c0_36 = arith.constant 0 : index
      %32 = arith.index_cast %31 : i32 to index
      %c2 = arith.constant 2 : index
      %c0_37 = arith.constant 0 : index
      %33 = vector.load %arg1[%c0_36, %32, %c2, %c0_37] : memref<1x64x64x4xf32, #tpu.memory_space<vmem>>, vector<1x1x62x4xf32>
      %34 = vector.shape_cast %33 : vector<1x1x62x4xf32> to vector<62x4xf32>
      %35 = arith.truncf %34 : vector<62x4xf32> to vector<62x4xbf16>
      %c2_38 = arith.constant 2 : index
      %c0_39 = arith.constant 0 : index
      %c0_40 = arith.constant 0 : index
      %36 = vector.load %arg2[%c2_38, %c0_39, %c0_40] : memref<9x4x32xbf16, #tpu.memory_space<vmem>>, vector<1x4x32xbf16>
      %37 = vector.shape_cast %36 : vector<1x4x32xbf16> to vector<4x32xbf16>
      %cst_41 = arith.constant dense<0.000000e+00> : vector<62x32xf32>
      %38 = tpu.matmul %35, %37, %cst_41 {dimension_numbers = #tpu.dot_dimension_numbers<[1], [0], [0], [1], [0, 0, 1, 1], [], []>} : vector<62x4xbf16>, vector<4x32xbf16>, vector<62x32xf32> -> vector<62x32xf32>
      %39 = arith.addf %29, %38 : vector<62x32xf32>
      %c2_i32_42 = arith.constant 2 : i32
      %40 = arith.muli %c2_i32_42, %arg14 : i32
      %c1_i32_43 = arith.constant 1 : i32
      %41 = arith.addi %40, %c1_i32_43 : i32
      %c0_44 = arith.constant 0 : index
      %42 = arith.index_cast %41 : i32 to index
      %c0_45 = arith.constant 0 : index
      %c0_46 = arith.constant 0 : index
      %43 = vector.load %arg1[%c0_44, %42, %c0_45, %c0_46] : memref<1x64x64x4xf32, #tpu.memory_space<vmem>>, vector<1x1x62x4xf32>
      %44 = vector.shape_cast %43 : vector<1x1x62x4xf32> to vector<62x4xf32>
      %45 = arith.truncf %44 : vector<62x4xf32> to vector<62x4xbf16>
      %c3 = arith.constant 3 : index
      %c0_47 = arith.constant 0 : index
      %c0_48 = arith.constant 0 : index
      %46 = vector.load %arg2[%c3, %c0_47, %c0_48] : memref<9x4x32xbf16, #tpu.memory_space<vmem>>, vector<1x4x32xbf16>
      %47 = vector.shape_cast %46 : vector<1x4x32xbf16> to vector<4x32xbf16>
      %cst_49 = arith.constant dense<0.000000e+00> : vector<62x32xf32>
      %48 = tpu.matmul %45, %47, %cst_49 {dimension_numbers = #tpu.dot_dimension_numbers<[1], [0], [0], [1], [0, 0, 1, 1], [], []>} : vector<62x4xbf16>, vector<4x32xbf16>, vector<62x32xf32> -> vector<62x32xf32>
      %49 = arith.addf %39, %48 : vector<62x32xf32>
      %c2_i32_50 = arith.constant 2 : i32
      %50 = arith.muli %c2_i32_50, %arg14 : i32
      %c1_i32_51 = arith.constant 1 : i32
      %51 = arith.addi %50, %c1_i32_51 : i32
      %c0_52 = arith.constant 0 : index
      %52 = arith.index_cast %51 : i32 to index
      %c1_53 = arith.constant 1 : index
      %c0_54 = arith.constant 0 : index
      %53 = vector.load %arg1[%c0_52, %52, %c1_53, %c0_54] : memref<1x64x64x4xf32, #tpu.memory_space<vmem>>, vector<1x1x62x4xf32>
      %54 = vector.shape_cast %53 : vector<1x1x62x4xf32> to vector<62x4xf32>
      %55 = arith.truncf %54 : vector<62x4xf32> to vector<62x4xbf16>
      %c4 = arith.constant 4 : index
      %c0_55 = arith.constant 0 : index
      %c0_56 = arith.constant 0 : index
      %56 = vector.load %arg2[%c4, %c0_55, %c0_56] : memref<9x4x32xbf16, #tpu.memory_space<vmem>>, vector<1x4x32xbf16>
      %57 = vector.shape_cast %56 : vector<1x4x32xbf16> to vector<4x32xbf16>
      %cst_57 = arith.constant dense<0.000000e+00> : vector<62x32xf32>
      %58 = tpu.matmul %55, %57, %cst_57 {dimension_numbers = #tpu.dot_dimension_numbers<[1], [0], [0], [1], [0, 0, 1, 1], [], []>} : vector<62x4xbf16>, vector<4x32xbf16>, vector<62x32xf32> -> vector<62x32xf32>
      %59 = arith.addf %49, %58 : vector<62x32xf32>
      %c2_i32_58 = arith.constant 2 : i32
      %60 = arith.muli %c2_i32_58, %arg14 : i32
      %c1_i32_59 = arith.constant 1 : i32
      %61 = arith.addi %60, %c1_i32_59 : i32
      %c0_60 = arith.constant 0 : index
      %62 = arith.index_cast %61 : i32 to index
      %c2_61 = arith.constant 2 : index
      %c0_62 = arith.constant 0 : index
      %63 = vector.load %arg1[%c0_60, %62, %c2_61, %c0_62] : memref<1x64x64x4xf32, #tpu.memory_space<vmem>>, vector<1x1x62x4xf32>
      %64 = vector.shape_cast %63 : vector<1x1x62x4xf32> to vector<62x4xf32>
      %65 = arith.truncf %64 : vector<62x4xf32> to vector<62x4xbf16>
      %c5 = arith.constant 5 : index
      %c0_63 = arith.constant 0 : index
      %c0_64 = arith.constant 0 : index
      %66 = vector.load %arg2[%c5, %c0_63, %c0_64] : memref<9x4x32xbf16, #tpu.memory_space<vmem>>, vector<1x4x32xbf16>
      %67 = vector.shape_cast %66 : vector<1x4x32xbf16> to vector<4x32xbf16>
      %cst_65 = arith.constant dense<0.000000e+00> : vector<62x32xf32>
      %68 = tpu.matmul %65, %67, %cst_65 {dimension_numbers = #tpu.dot_dimension_numbers<[1], [0], [0], [1], [0, 0, 1, 1], [], []>} : vector<62x4xbf16>, vector<4x32xbf16>, vector<62x32xf32> -> vector<62x32xf32>
      %69 = arith.addf %59, %68 : vector<62x32xf32>
      %c2_i32_66 = arith.constant 2 : i32
      %70 = arith.muli %c2_i32_66, %arg14 : i32
      %c2_i32_67 = arith.constant 2 : i32
      %71 = arith.addi %70, %c2_i32_67 : i32
      %c0_68 = arith.constant 0 : index
      %72 = arith.index_cast %71 : i32 to index
      %c0_69 = arith.constant 0 : index
      %c0_70 = arith.constant 0 : index
      %73 = vector.load %arg1[%c0_68, %72, %c0_69, %c0_70] : memref<1x64x64x4xf32, #tpu.memory_space<vmem>>, vector<1x1x62x4xf32>
      %74 = vector.shape_cast %73 : vector<1x1x62x4xf32> to vector<62x4xf32>
      %75 = arith.truncf %74 : vector<62x4xf32> to vector<62x4xbf16>
      %c6 = arith.constant 6 : index
      %c0_71 = arith.constant 0 : index
      %c0_72 = arith.constant 0 : index
      %76 = vector.load %arg2[%c6, %c0_71, %c0_72] : memref<9x4x32xbf16, #tpu.memory_space<vmem>>, vector<1x4x32xbf16>
      %77 = vector.shape_cast %76 : vector<1x4x32xbf16> to vector<4x32xbf16>
      %cst_73 = arith.constant dense<0.000000e+00> : vector<62x32xf32>
      %78 = tpu.matmul %75, %77, %cst_73 {dimension_numbers = #tpu.dot_dimension_numbers<[1], [0], [0], [1], [0, 0, 1, 1], [], []>} : vector<62x4xbf16>, vector<4x32xbf16>, vector<62x32xf32> -> vector<62x32xf32>
      %79 = arith.addf %69, %78 : vector<62x32xf32>
      %c2_i32_74 = arith.constant 2 : i32
      %80 = arith.muli %c2_i32_74, %arg14 : i32
      %c2_i32_75 = arith.constant 2 : i32
      %81 = arith.addi %80, %c2_i32_75 : i32
      %c0_76 = arith.constant 0 : index
      %82 = arith.index_cast %81 : i32 to index
      %c1_77 = arith.constant 1 : index
      %c0_78 = arith.constant 0 : index
      %83 = vector.load %arg1[%c0_76, %82, %c1_77, %c0_78] : memref<1x64x64x4xf32, #tpu.memory_space<vmem>>, vector<1x1x62x4xf32>
      %84 = vector.shape_cast %83 : vector<1x1x62x4xf32> to vector<62x4xf32>
      %85 = arith.truncf %84 : vector<62x4xf32> to vector<62x4xbf16>
      %c7 = arith.constant 7 : index
      %c0_79 = arith.constant 0 : index
      %c0_80 = arith.constant 0 : index
      %86 = vector.load %arg2[%c7, %c0_79, %c0_80] : memref<9x4x32xbf16, #tpu.memory_space<vmem>>, vector<1x4x32xbf16>
      %87 = vector.shape_cast %86 : vector<1x4x32xbf16> to vector<4x32xbf16>
      %cst_81 = arith.constant dense<0.000000e+00> : vector<62x32xf32>
      %88 = tpu.matmul %85, %87, %cst_81 {dimension_numbers = #tpu.dot_dimension_numbers<[1], [0], [0], [1], [0, 0, 1, 1], [], []>} : vector<62x4xbf16>, vector<4x32xbf16>, vector<62x32xf32> -> vector<62x32xf32>
      %89 = arith.addf %79, %88 : vector<62x32xf32>
      %c2_i32_82 = arith.constant 2 : i32
      %90 = arith.muli %c2_i32_82, %arg14 : i32
      %c2_i32_83 = arith.constant 2 : i32
      %91 = arith.addi %90, %c2_i32_83 : i32
      %c0_84 = arith.constant 0 : index
      %92 = arith.index_cast %91 : i32 to index
      %c2_85 = arith.constant 2 : index
      %c0_86 = arith.constant 0 : index
      %93 = vector.load %arg1[%c0_84, %92, %c2_85, %c0_86] : memref<1x64x64x4xf32, #tpu.memory_space<vmem>>, vector<1x1x62x4xf32>
      %94 = vector.shape_cast %93 : vector<1x1x62x4xf32> to vector<62x4xf32>
      %95 = arith.truncf %94 : vector<62x4xf32> to vector<62x4xbf16>
      %c8 = arith.constant 8 : index
      %c0_87 = arith.constant 0 : index
      %c0_88 = arith.constant 0 : index
      %96 = vector.load %arg2[%c8, %c0_87, %c0_88] : memref<9x4x32xbf16, #tpu.memory_space<vmem>>, vector<1x4x32xbf16>
      %97 = vector.shape_cast %96 : vector<1x4x32xbf16> to vector<4x32xbf16>
      %cst_89 = arith.constant dense<0.000000e+00> : vector<62x32xf32>
      %98 = tpu.matmul %95, %97, %cst_89 {dimension_numbers = #tpu.dot_dimension_numbers<[1], [0], [0], [1], [0, 0, 1, 1], [], []>} : vector<62x4xbf16>, vector<4x32xbf16>, vector<62x32xf32> -> vector<62x32xf32>
      %99 = arith.addf %89, %98 : vector<62x32xf32>
      %cst_90 = arith.constant dense<0.000000e+00> : vector<31x32xf32>
      %100 = tpu.matmul %0, %99, %cst_90 {dimension_numbers = #tpu.dot_dimension_numbers<[1], [0], [0], [1], [0, 0, 1, 1], [], []>} : vector<31x62xf32>, vector<62x32xf32>, vector<31x32xf32> -> vector<31x32xf32>
      %101 = vector.broadcast %1 : vector<1x32xf32> to vector<31x32xf32>
      %102 = arith.addf %100, %101 : vector<31x32xf32>
      %cst_91 = arith.constant 0.000000e+00 : f32
      %103 = vector.broadcast %cst_91 : f32 to vector<31x32xf32>
      %104 = arith.maximumf %102, %103 : vector<31x32xf32>
      %105 = arith.index_cast %arg14 : i32 to index
      %c0_92 = arith.constant 0 : index
      %c0_93 = arith.constant 0 : index
      %106 = vector.load %arg12[%105, %c0_92, %c0_93] : memref<31x31x32xf32, #tpu.memory_space<vmem>>, vector<1x31x32xf32>
      %107 = vector.shape_cast %106 : vector<1x31x32xf32> to vector<31x32xf32>
      %108 = vector.shape_cast %104 : vector<31x32xf32> to vector<1x31x32xf32>
      tpu.vector_store %arg12[%105, %c0_92, %c0_93], %108 {strides = array<i32>} : memref<31x31x32xf32, #tpu.memory_space<vmem>>, vector<1x31x32xf32>,
    }
    %c31_i32_3 = arith.constant 31 : i32
    %c0_4 = arith.constant 0 : index
    %c0_5 = arith.constant 0 : index
    %3 = vector.load %arg9[%c0_4, %c0_5] : memref<15x29xf32, #tpu.memory_space<vmem>>, vector<15x29xf32>
    %c0_6 = arith.constant 0 : index
    %c0_7 = arith.constant 0 : index
    %4 = vector.load %arg6[%c0_6, %c0_7] : memref<1x64xf32, #tpu.memory_space<vmem>>, vector<1x64xf32>
    %c0_i32_8 = arith.constant 0 : i32
    %c15_i32 = arith.constant 15 : i32
    %5 = arith.addi %c0_i32_8, %c15_i32 : i32
    %c1_i32_9 = arith.constant 1 : i32
    scf.for %arg14 = %c0_i32_8 to %5 step %c1_i32_9  : i32 {
      %cst = arith.constant 0.000000e+00 : f32
      %9 = vector.broadcast %cst : f32 to vector<29x64xf32>
      %c2_i32 = arith.constant 2 : i32
      %10 = arith.muli %c2_i32, %arg14 : i32
      %c0_i32_18 = arith.constant 0 : i32
      %11 = arith.addi %10, %c0_i32_18 : i32
      %12 = arith.index_cast %11 : i32 to index
      %c0_19 = arith.constant 0 : index
      %c0_20 = arith.constant 0 : index
      %13 = vector.load %arg12[%12, %c0_19, %c0_20] : memref<31x31x32xf32, #tpu.memory_space<vmem>>, vector<1x29x32xf32>
      %14 = vector.shape_cast %13 : vector<1x29x32xf32> to vector<29x32xf32>
      %15 = arith.truncf %14 : vector<29x32xf32> to vector<29x32xbf16>
      %c0_21 = arith.constant 0 : index
      %c0_22 = arith.constant 0 : index
      %c0_23 = arith.constant 0 : index
      %16 = vector.load %arg3[%c0_21, %c0_22, %c0_23] : memref<9x32x64xbf16, #tpu.memory_space<vmem>>, vector<1x32x64xbf16>
      %17 = vector.shape_cast %16 : vector<1x32x64xbf16> to vector<32x64xbf16>
      %cst_24 = arith.constant dense<0.000000e+00> : vector<29x64xf32>
      %18 = tpu.matmul %15, %17, %cst_24 {dimension_numbers = #tpu.dot_dimension_numbers<[1], [0], [0], [1], [0, 0, 1, 1], [], []>} : vector<29x32xbf16>, vector<32x64xbf16>, vector<29x64xf32> -> vector<29x64xf32>
      %19 = arith.addf %9, %18 : vector<29x64xf32>
      %c2_i32_25 = arith.constant 2 : i32
      %20 = arith.muli %c2_i32_25, %arg14 : i32
      %c0_i32_26 = arith.constant 0 : i32
      %21 = arith.addi %20, %c0_i32_26 : i32
      %22 = arith.index_cast %21 : i32 to index
      %c1 = arith.constant 1 : index
      %c0_27 = arith.constant 0 : index
      %23 = vector.load %arg12[%22, %c1, %c0_27] : memref<31x31x32xf32, #tpu.memory_space<vmem>>, vector<1x29x32xf32>
      %24 = vector.shape_cast %23 : vector<1x29x32xf32> to vector<29x32xf32>
      %25 = arith.truncf %24 : vector<29x32xf32> to vector<29x32xbf16>
      %c1_28 = arith.constant 1 : index
      %c0_29 = arith.constant 0 : index
      %c0_30 = arith.constant 0 : index
      %26 = vector.load %arg3[%c1_28, %c0_29, %c0_30] : memref<9x32x64xbf16, #tpu.memory_space<vmem>>, vector<1x32x64xbf16>
      %27 = vector.shape_cast %26 : vector<1x32x64xbf16> to vector<32x64xbf16>
      %cst_31 = arith.constant dense<0.000000e+00> : vector<29x64xf32>
      %28 = tpu.matmul %25, %27, %cst_31 {dimension_numbers = #tpu.dot_dimension_numbers<[1], [0], [0], [1], [0, 0, 1, 1], [], []>} : vector<29x32xbf16>, vector<32x64xbf16>, vector<29x64xf32> -> vector<29x64xf32>
      %29 = arith.addf %19, %28 : vector<29x64xf32>
      %c2_i32_32 = arith.constant 2 : i32
      %30 = arith.muli %c2_i32_32, %arg14 : i32
      %c0_i32_33 = arith.constant 0 : i32
      %31 = arith.addi %30, %c0_i32_33 : i32
      %32 = arith.index_cast %31 : i32 to index
      %c2 = arith.constant 2 : index
      %c0_34 = arith.constant 0 : index
      %33 = vector.load %arg12[%32, %c2, %c0_34] : memref<31x31x32xf32, #tpu.memory_space<vmem>>, vector<1x29x32xf32>
      %34 = vector.shape_cast %33 : vector<1x29x32xf32> to vector<29x32xf32>
      %35 = arith.truncf %34 : vector<29x32xf32> to vector<29x32xbf16>
      %c2_35 = arith.constant 2 : index
      %c0_36 = arith.constant 0 : index
      %c0_37 = arith.constant 0 : index
      %36 = vector.load %arg3[%c2_35, %c0_36, %c0_37] : memref<9x32x64xbf16, #tpu.memory_space<vmem>>, vector<1x32x64xbf16>
      %37 = vector.shape_cast %36 : vector<1x32x64xbf16> to vector<32x64xbf16>
      %cst_38 = arith.constant dense<0.000000e+00> : vector<29x64xf32>
      %38 = tpu.matmul %35, %37, %cst_38 {dimension_numbers = #tpu.dot_dimension_numbers<[1], [0], [0], [1], [0, 0, 1, 1], [], []>} : vector<29x32xbf16>, vector<32x64xbf16>, vector<29x64xf32> -> vector<29x64xf32>
      %39 = arith.addf %29, %38 : vector<29x64xf32>
      %c2_i32_39 = arith.constant 2 : i32
      %40 = arith.muli %c2_i32_39, %arg14 : i32
      %c1_i32_40 = arith.constant 1 : i32
      %41 = arith.addi %40, %c1_i32_40 : i32
      %42 = arith.index_cast %41 : i32 to index
      %c0_41 = arith.constant 0 : index
      %c0_42 = arith.constant 0 : index
      %43 = vector.load %arg12[%42, %c0_41, %c0_42] : memref<31x31x32xf32, #tpu.memory_space<vmem>>, vector<1x29x32xf32>
      %44 = vector.shape_cast %43 : vector<1x29x32xf32> to vector<29x32xf32>
      %45 = arith.truncf %44 : vector<29x32xf32> to vector<29x32xbf16>
      %c3 = arith.constant 3 : index
      %c0_43 = arith.constant 0 : index
      %c0_44 = arith.constant 0 : index
      %46 = vector.load %arg3[%c3, %c0_43, %c0_44] : memref<9x32x64xbf16, #tpu.memory_space<vmem>>, vector<1x32x64xbf16>
      %47 = vector.shape_cast %46 : vector<1x32x64xbf16> to vector<32x64xbf16>
      %cst_45 = arith.constant dense<0.000000e+00> : vector<29x64xf32>
      %48 = tpu.matmul %45, %47, %cst_45 {dimension_numbers = #tpu.dot_dimension_numbers<[1], [0], [0], [1], [0, 0, 1, 1], [], []>} : vector<29x32xbf16>, vector<32x64xbf16>, vector<29x64xf32> -> vector<29x64xf32>
      %49 = arith.addf %39, %48 : vector<29x64xf32>
      %c2_i32_46 = arith.constant 2 : i32
      %50 = arith.muli %c2_i32_46, %arg14 : i32
      %c1_i32_47 = arith.constant 1 : i32
      %51 = arith.addi %50, %c1_i32_47 : i32
      %52 = arith.index_cast %51 : i32 to index
      %c1_48 = arith.constant 1 : index
      %c0_49 = arith.constant 0 : index
      %53 = vector.load %arg12[%52, %c1_48, %c0_49] : memref<31x31x32xf32, #tpu.memory_space<vmem>>, vector<1x29x32xf32>
      %54 = vector.shape_cast %53 : vector<1x29x32xf32> to vector<29x32xf32>
      %55 = arith.truncf %54 : vector<29x32xf32> to vector<29x32xbf16>
      %c4 = arith.constant 4 : index
      %c0_50 = arith.constant 0 : index
      %c0_51 = arith.constant 0 : index
      %56 = vector.load %arg3[%c4, %c0_50, %c0_51] : memref<9x32x64xbf16, #tpu.memory_space<vmem>>, vector<1x32x64xbf16>
      %57 = vector.shape_cast %56 : vector<1x32x64xbf16> to vector<32x64xbf16>
      %cst_52 = arith.constant dense<0.000000e+00> : vector<29x64xf32>
      %58 = tpu.matmul %55, %57, %cst_52 {dimension_numbers = #tpu.dot_dimension_numbers<[1], [0], [0], [1], [0, 0, 1, 1], [], []>} : vector<29x32xbf16>, vector<32x64xbf16>, vector<29x64xf32> -> vector<29x64xf32>
      %59 = arith.addf %49, %58 : vector<29x64xf32>
      %c2_i32_53 = arith.constant 2 : i32
      %60 = arith.muli %c2_i32_53, %arg14 : i32
      %c1_i32_54 = arith.constant 1 : i32
      %61 = arith.addi %60, %c1_i32_54 : i32
      %62 = arith.index_cast %61 : i32 to index
      %c2_55 = arith.constant 2 : index
      %c0_56 = arith.constant 0 : index
      %63 = vector.load %arg12[%62, %c2_55, %c0_56] : memref<31x31x32xf32, #tpu.memory_space<vmem>>, vector<1x29x32xf32>
      %64 = vector.shape_cast %63 : vector<1x29x32xf32> to vector<29x32xf32>
      %65 = arith.truncf %64 : vector<29x32xf32> to vector<29x32xbf16>
      %c5 = arith.constant 5 : index
      %c0_57 = arith.constant 0 : index
      %c0_58 = arith.constant 0 : index
      %66 = vector.load %arg3[%c5, %c0_57, %c0_58] : memref<9x32x64xbf16, #tpu.memory_space<vmem>>, vector<1x32x64xbf16>
      %67 = vector.shape_cast %66 : vector<1x32x64xbf16> to vector<32x64xbf16>
      %cst_59 = arith.constant dense<0.000000e+00> : vector<29x64xf32>
      %68 = tpu.matmul %65, %67, %cst_59 {dimension_numbers = #tpu.dot_dimension_numbers<[1], [0], [0], [1], [0, 0, 1, 1], [], []>} : vector<29x32xbf16>, vector<32x64xbf16>, vector<29x64xf32> -> vector<29x64xf32>
      %69 = arith.addf %59, %68 : vector<29x64xf32>
      %c2_i32_60 = arith.constant 2 : i32
      %70 = arith.muli %c2_i32_60, %arg14 : i32
      %c2_i32_61 = arith.constant 2 : i32
      %71 = arith.addi %70, %c2_i32_61 : i32
      %72 = arith.index_cast %71 : i32 to index
      %c0_62 = arith.constant 0 : index
      %c0_63 = arith.constant 0 : index
      %73 = vector.load %arg12[%72, %c0_62, %c0_63] : memref<31x31x32xf32, #tpu.memory_space<vmem>>, vector<1x29x32xf32>
      %74 = vector.shape_cast %73 : vector<1x29x32xf32> to vector<29x32xf32>
      %75 = arith.truncf %74 : vector<29x32xf32> to vector<29x32xbf16>
      %c6 = arith.constant 6 : index
      %c0_64 = arith.constant 0 : index
      %c0_65 = arith.constant 0 : index
      %76 = vector.load %arg3[%c6, %c0_64, %c0_65] : memref<9x32x64xbf16, #tpu.memory_space<vmem>>, vector<1x32x64xbf16>
      %77 = vector.shape_cast %76 : vector<1x32x64xbf16> to vector<32x64xbf16>
      %cst_66 = arith.constant dense<0.000000e+00> : vector<29x64xf32>
      %78 = tpu.matmul %75, %77, %cst_66 {dimension_numbers = #tpu.dot_dimension_numbers<[1], [0], [0], [1], [0, 0, 1, 1], [], []>} : vector<29x32xbf16>, vector<32x64xbf16>, vector<29x64xf32> -> vector<29x64xf32>
      %79 = arith.addf %69, %78 : vector<29x64xf32>
      %c2_i32_67 = arith.constant 2 : i32
      %80 = arith.muli %c2_i32_67, %arg14 : i32
      %c2_i32_68 = arith.constant 2 : i32
      %81 = arith.addi %80, %c2_i32_68 : i32
      %82 = arith.index_cast %81 : i32 to index
      %c1_69 = arith.constant 1 : index
      %c0_70 = arith.constant 0 : index
      %83 = vector.load %arg12[%82, %c1_69, %c0_70] : memref<31x31x32xf32, #tpu.memory_space<vmem>>, vector<1x29x32xf32>
      %84 = vector.shape_cast %83 : vector<1x29x32xf32> to vector<29x32xf32>
      %85 = arith.truncf %84 : vector<29x32xf32> to vector<29x32xbf16>
      %c7 = arith.constant 7 : index
      %c0_71 = arith.constant 0 : index
      %c0_72 = arith.constant 0 : index
      %86 = vector.load %arg3[%c7, %c0_71, %c0_72] : memref<9x32x64xbf16, #tpu.memory_space<vmem>>, vector<1x32x64xbf16>
      %87 = vector.shape_cast %86 : vector<1x32x64xbf16> to vector<32x64xbf16>
      %cst_73 = arith.constant dense<0.000000e+00> : vector<29x64xf32>
      %88 = tpu.matmul %85, %87, %cst_73 {dimension_numbers = #tpu.dot_dimension_numbers<[1], [0], [0], [1], [0, 0, 1, 1], [], []>} : vector<29x32xbf16>, vector<32x64xbf16>, vector<29x64xf32> -> vector<29x64xf32>
      %89 = arith.addf %79, %88 : vector<29x64xf32>
      %c2_i32_74 = arith.constant 2 : i32
      %90 = arith.muli %c2_i32_74, %arg14 : i32
      %c2_i32_75 = arith.constant 2 : i32
      %91 = arith.addi %90, %c2_i32_75 : i32
      %92 = arith.index_cast %91 : i32 to index
      %c2_76 = arith.constant 2 : index
      %c0_77 = arith.constant 0 : index
      %93 = vector.load %arg12[%92, %c2_76, %c0_77] : memref<31x31x32xf32, #tpu.memory_space<vmem>>, vector<1x29x32xf32>
      %94 = vector.shape_cast %93 : vector<1x29x32xf32> to vector<29x32xf32>
      %95 = arith.truncf %94 : vector<29x32xf32> to vector<29x32xbf16>
      %c8 = arith.constant 8 : index
      %c0_78 = arith.constant 0 : index
      %c0_79 = arith.constant 0 : index
      %96 = vector.load %arg3[%c8, %c0_78, %c0_79] : memref<9x32x64xbf16, #tpu.memory_space<vmem>>, vector<1x32x64xbf16>
      %97 = vector.shape_cast %96 : vector<1x32x64xbf16> to vector<32x64xbf16>
      %cst_80 = arith.constant dense<0.000000e+00> : vector<29x64xf32>
      %98 = tpu.matmul %95, %97, %cst_80 {dimension_numbers = #tpu.dot_dimension_numbers<[1], [0], [0], [1], [0, 0, 1, 1], [], []>} : vector<29x32xbf16>, vector<32x64xbf16>, vector<29x64xf32> -> vector<29x64xf32>
      %99 = arith.addf %89, %98 : vector<29x64xf32>
      %cst_81 = arith.constant dense<0.000000e+00> : vector<15x64xf32>
      %100 = tpu.matmul %3, %99, %cst_81 {dimension_numbers = #tpu.dot_dimension_numbers<[1], [0], [0], [1], [0, 0, 1, 1], [], []>} : vector<15x29xf32>, vector<29x64xf32>, vector<15x64xf32> -> vector<15x64xf32>
      %101 = vector.broadcast %4 : vector<1x64xf32> to vector<15x64xf32>
      %102 = arith.addf %100, %101 : vector<15x64xf32>
      %cst_82 = arith.constant 0.000000e+00 : f32
      %103 = vector.broadcast %cst_82 : f32 to vector<15x64xf32>
      %104 = arith.maximumf %102, %103 : vector<15x64xf32>
      %105 = arith.index_cast %arg14 : i32 to index
      %c0_83 = arith.constant 0 : index
      %c0_84 = arith.constant 0 : index
      %106 = vector.load %arg13[%105, %c0_83, %c0_84] : memref<15x15x64xf32, #tpu.memory_space<vmem>>, vector<1x15x64xf32>
      %107 = vector.shape_cast %106 : vector<1x15x64xf32> to vector<15x64xf32>
      %108 = vector.shape_cast %104 : vector<15x64xf32> to vector<1x15x64xf32>
      tpu.vector_store %arg13[%105, %c0_83, %c0_84], %108 {strides = array<i32>} : memref<15x15x64xf32, #tpu.memory_space<vmem>>, vector<1x15x64xf32>,
    }
    %c15_i32_10 = arith.constant 15 : i32
    %c0_11 = arith.constant 0 : index
    %c0_12 = arith.constant 0 : index
    %6 = vector.load %arg10[%c0_11, %c0_12] : memref<7x13xf32, #tpu.memory_space<vmem>>, vector<7x13xf32>
    %c0_13 = arith.constant 0 : index
    %c0_14 = arith.constant 0 : index
    %7 = vector.load %arg7[%c0_13, %c0_14] : memref<1x64xf32, #tpu.memory_space<vmem>>, vector<1x64xf32>
    %c0_i32_15 = arith.constant 0 : i32
    %c7_i32 = arith.constant 7 : i32
    %8 = arith.addi %c0_i32_15, %c7_i32 : i32
    %c1_i32_16 = arith.constant 1 : i32
    scf.for %arg14 = %c0_i32_15 to %8 step %c1_i32_16  : i32 {
      %cst = arith.constant 0.000000e+00 : f32
      %9 = vector.broadcast %cst : f32 to vector<13x64xf32>
      %c2_i32 = arith.constant 2 : i32
      %10 = arith.muli %c2_i32, %arg14 : i32
      %c0_i32_18 = arith.constant 0 : i32
      %11 = arith.addi %10, %c0_i32_18 : i32
      %12 = arith.index_cast %11 : i32 to index
      %c0_19 = arith.constant 0 : index
      %c0_20 = arith.constant 0 : index
      %13 = vector.load %arg13[%12, %c0_19, %c0_20] : memref<15x15x64xf32, #tpu.memory_space<vmem>>, vector<1x13x64xf32>
      %14 = vector.shape_cast %13 : vector<1x13x64xf32> to vector<13x64xf32>
      %15 = arith.truncf %14 : vector<13x64xf32> to vector<13x64xbf16>
      %c0_21 = arith.constant 0 : index
      %c0_22 = arith.constant 0 : index
      %c0_23 = arith.constant 0 : index
      %16 = vector.load %arg4[%c0_21, %c0_22, %c0_23] : memref<9x64x64xbf16, #tpu.memory_space<vmem>>, vector<1x64x64xbf16>
      %17 = vector.shape_cast %16 : vector<1x64x64xbf16> to vector<64x64xbf16>
      %cst_24 = arith.constant dense<0.000000e+00> : vector<13x64xf32>
      %18 = tpu.matmul %15, %17, %cst_24 {dimension_numbers = #tpu.dot_dimension_numbers<[1], [0], [0], [1], [0, 0, 1, 1], [], []>} : vector<13x64xbf16>, vector<64x64xbf16>, vector<13x64xf32> -> vector<13x64xf32>
      %19 = arith.addf %9, %18 : vector<13x64xf32>
      %c2_i32_25 = arith.constant 2 : i32
      %20 = arith.muli %c2_i32_25, %arg14 : i32
      %c0_i32_26 = arith.constant 0 : i32
      %21 = arith.addi %20, %c0_i32_26 : i32
      %22 = arith.index_cast %21 : i32 to index
      %c1 = arith.constant 1 : index
      %c0_27 = arith.constant 0 : index
      %23 = vector.load %arg13[%22, %c1, %c0_27] : memref<15x15x64xf32, #tpu.memory_space<vmem>>, vector<1x13x64xf32>
      %24 = vector.shape_cast %23 : vector<1x13x64xf32> to vector<13x64xf32>
      %25 = arith.truncf %24 : vector<13x64xf32> to vector<13x64xbf16>
      %c1_28 = arith.constant 1 : index
      %c0_29 = arith.constant 0 : index
      %c0_30 = arith.constant 0 : index
      %26 = vector.load %arg4[%c1_28, %c0_29, %c0_30] : memref<9x64x64xbf16, #tpu.memory_space<vmem>>, vector<1x64x64xbf16>
      %27 = vector.shape_cast %26 : vector<1x64x64xbf16> to vector<64x64xbf16>
      %cst_31 = arith.constant dense<0.000000e+00> : vector<13x64xf32>
      %28 = tpu.matmul %25, %27, %cst_31 {dimension_numbers = #tpu.dot_dimension_numbers<[1], [0], [0], [1], [0, 0, 1, 1], [], []>} : vector<13x64xbf16>, vector<64x64xbf16>, vector<13x64xf32> -> vector<13x64xf32>
      %29 = arith.addf %19, %28 : vector<13x64xf32>
      %c2_i32_32 = arith.constant 2 : i32
      %30 = arith.muli %c2_i32_32, %arg14 : i32
      %c0_i32_33 = arith.constant 0 : i32
      %31 = arith.addi %30, %c0_i32_33 : i32
      %32 = arith.index_cast %31 : i32 to index
      %c2 = arith.constant 2 : index
      %c0_34 = arith.constant 0 : index
      %33 = vector.load %arg13[%32, %c2, %c0_34] : memref<15x15x64xf32, #tpu.memory_space<vmem>>, vector<1x13x64xf32>
      %34 = vector.shape_cast %33 : vector<1x13x64xf32> to vector<13x64xf32>
      %35 = arith.truncf %34 : vector<13x64xf32> to vector<13x64xbf16>
      %c2_35 = arith.constant 2 : index
      %c0_36 = arith.constant 0 : index
      %c0_37 = arith.constant 0 : index
      %36 = vector.load %arg4[%c2_35, %c0_36, %c0_37] : memref<9x64x64xbf16, #tpu.memory_space<vmem>>, vector<1x64x64xbf16>
      %37 = vector.shape_cast %36 : vector<1x64x64xbf16> to vector<64x64xbf16>
      %cst_38 = arith.constant dense<0.000000e+00> : vector<13x64xf32>
      %38 = tpu.matmul %35, %37, %cst_38 {dimension_numbers = #tpu.dot_dimension_numbers<[1], [0], [0], [1], [0, 0, 1, 1], [], []>} : vector<13x64xbf16>, vector<64x64xbf16>, vector<13x64xf32> -> vector<13x64xf32>
      %39 = arith.addf %29, %38 : vector<13x64xf32>
      %c2_i32_39 = arith.constant 2 : i32
      %40 = arith.muli %c2_i32_39, %arg14 : i32
      %c1_i32_40 = arith.constant 1 : i32
      %41 = arith.addi %40, %c1_i32_40 : i32
      %42 = arith.index_cast %41 : i32 to index
      %c0_41 = arith.constant 0 : index
      %c0_42 = arith.constant 0 : index
      %43 = vector.load %arg13[%42, %c0_41, %c0_42] : memref<15x15x64xf32, #tpu.memory_space<vmem>>, vector<1x13x64xf32>
      %44 = vector.shape_cast %43 : vector<1x13x64xf32> to vector<13x64xf32>
      %45 = arith.truncf %44 : vector<13x64xf32> to vector<13x64xbf16>
      %c3 = arith.constant 3 : index
      %c0_43 = arith.constant 0 : index
      %c0_44 = arith.constant 0 : index
      %46 = vector.load %arg4[%c3, %c0_43, %c0_44] : memref<9x64x64xbf16, #tpu.memory_space<vmem>>, vector<1x64x64xbf16>
      %47 = vector.shape_cast %46 : vector<1x64x64xbf16> to vector<64x64xbf16>
      %cst_45 = arith.constant dense<0.000000e+00> : vector<13x64xf32>
      %48 = tpu.matmul %45, %47, %cst_45 {dimension_numbers = #tpu.dot_dimension_numbers<[1], [0], [0], [1], [0, 0, 1, 1], [], []>} : vector<13x64xbf16>, vector<64x64xbf16>, vector<13x64xf32> -> vector<13x64xf32>
      %49 = arith.addf %39, %48 : vector<13x64xf32>
      %c2_i32_46 = arith.constant 2 : i32
      %50 = arith.muli %c2_i32_46, %arg14 : i32
      %c1_i32_47 = arith.constant 1 : i32
      %51 = arith.addi %50, %c1_i32_47 : i32
      %52 = arith.index_cast %51 : i32 to index
      %c1_48 = arith.constant 1 : index
      %c0_49 = arith.constant 0 : index
      %53 = vector.load %arg13[%52, %c1_48, %c0_49] : memref<15x15x64xf32, #tpu.memory_space<vmem>>, vector<1x13x64xf32>
      %54 = vector.shape_cast %53 : vector<1x13x64xf32> to vector<13x64xf32>
      %55 = arith.truncf %54 : vector<13x64xf32> to vector<13x64xbf16>
      %c4 = arith.constant 4 : index
      %c0_50 = arith.constant 0 : index
      %c0_51 = arith.constant 0 : index
      %56 = vector.load %arg4[%c4, %c0_50, %c0_51] : memref<9x64x64xbf16, #tpu.memory_space<vmem>>, vector<1x64x64xbf16>
      %57 = vector.shape_cast %56 : vector<1x64x64xbf16> to vector<64x64xbf16>
      %cst_52 = arith.constant dense<0.000000e+00> : vector<13x64xf32>
      %58 = tpu.matmul %55, %57, %cst_52 {dimension_numbers = #tpu.dot_dimension_numbers<[1], [0], [0], [1], [0, 0, 1, 1], [], []>} : vector<13x64xbf16>, vector<64x64xbf16>, vector<13x64xf32> -> vector<13x64xf32>
      %59 = arith.addf %49, %58 : vector<13x64xf32>
      %c2_i32_53 = arith.constant 2 : i32
      %60 = arith.muli %c2_i32_53, %arg14 : i32
      %c1_i32_54 = arith.constant 1 : i32
      %61 = arith.addi %60, %c1_i32_54 : i32
      %62 = arith.index_cast %61 : i32 to index
      %c2_55 = arith.constant 2 : index
      %c0_56 = arith.constant 0 : index
      %63 = vector.load %arg13[%62, %c2_55, %c0_56] : memref<15x15x64xf32, #tpu.memory_space<vmem>>, vector<1x13x64xf32>
      %64 = vector.shape_cast %63 : vector<1x13x64xf32> to vector<13x64xf32>
      %65 = arith.truncf %64 : vector<13x64xf32> to vector<13x64xbf16>
      %c5 = arith.constant 5 : index
      %c0_57 = arith.constant 0 : index
      %c0_58 = arith.constant 0 : index
      %66 = vector.load %arg4[%c5, %c0_57, %c0_58] : memref<9x64x64xbf16, #tpu.memory_space<vmem>>, vector<1x64x64xbf16>
      %67 = vector.shape_cast %66 : vector<1x64x64xbf16> to vector<64x64xbf16>
      %cst_59 = arith.constant dense<0.000000e+00> : vector<13x64xf32>
      %68 = tpu.matmul %65, %67, %cst_59 {dimension_numbers = #tpu.dot_dimension_numbers<[1], [0], [0], [1], [0, 0, 1, 1], [], []>} : vector<13x64xbf16>, vector<64x64xbf16>, vector<13x64xf32> -> vector<13x64xf32>
      %69 = arith.addf %59, %68 : vector<13x64xf32>
      %c2_i32_60 = arith.constant 2 : i32
      %70 = arith.muli %c2_i32_60, %arg14 : i32
      %c2_i32_61 = arith.constant 2 : i32
      %71 = arith.addi %70, %c2_i32_61 : i32
      %72 = arith.index_cast %71 : i32 to index
      %c0_62 = arith.constant 0 : index
      %c0_63 = arith.constant 0 : index
      %73 = vector.load %arg13[%72, %c0_62, %c0_63] : memref<15x15x64xf32, #tpu.memory_space<vmem>>, vector<1x13x64xf32>
      %74 = vector.shape_cast %73 : vector<1x13x64xf32> to vector<13x64xf32>
      %75 = arith.truncf %74 : vector<13x64xf32> to vector<13x64xbf16>
      %c6 = arith.constant 6 : index
      %c0_64 = arith.constant 0 : index
      %c0_65 = arith.constant 0 : index
      %76 = vector.load %arg4[%c6, %c0_64, %c0_65] : memref<9x64x64xbf16, #tpu.memory_space<vmem>>, vector<1x64x64xbf16>
      %77 = vector.shape_cast %76 : vector<1x64x64xbf16> to vector<64x64xbf16>
      %cst_66 = arith.constant dense<0.000000e+00> : vector<13x64xf32>
      %78 = tpu.matmul %75, %77, %cst_66 {dimension_numbers = #tpu.dot_dimension_numbers<[1], [0], [0], [1], [0, 0, 1, 1], [], []>} : vector<13x64xbf16>, vector<64x64xbf16>, vector<13x64xf32> -> vector<13x64xf32>
      %79 = arith.addf %69, %78 : vector<13x64xf32>
      %c2_i32_67 = arith.constant 2 : i32
      %80 = arith.muli %c2_i32_67, %arg14 : i32
      %c2_i32_68 = arith.constant 2 : i32
      %81 = arith.addi %80, %c2_i32_68 : i32
      %82 = arith.index_cast %81 : i32 to index
      %c1_69 = arith.constant 1 : index
      %c0_70 = arith.constant 0 : index
      %83 = vector.load %arg13[%82, %c1_69, %c0_70] : memref<15x15x64xf32, #tpu.memory_space<vmem>>, vector<1x13x64xf32>
      %84 = vector.shape_cast %83 : vector<1x13x64xf32> to vector<13x64xf32>
      %85 = arith.truncf %84 : vector<13x64xf32> to vector<13x64xbf16>
      %c7 = arith.constant 7 : index
      %c0_71 = arith.constant 0 : index
      %c0_72 = arith.constant 0 : index
      %86 = vector.load %arg4[%c7, %c0_71, %c0_72] : memref<9x64x64xbf16, #tpu.memory_space<vmem>>, vector<1x64x64xbf16>
      %87 = vector.shape_cast %86 : vector<1x64x64xbf16> to vector<64x64xbf16>
      %cst_73 = arith.constant dense<0.000000e+00> : vector<13x64xf32>
      %88 = tpu.matmul %85, %87, %cst_73 {dimension_numbers = #tpu.dot_dimension_numbers<[1], [0], [0], [1], [0, 0, 1, 1], [], []>} : vector<13x64xbf16>, vector<64x64xbf16>, vector<13x64xf32> -> vector<13x64xf32>
      %89 = arith.addf %79, %88 : vector<13x64xf32>
      %c2_i32_74 = arith.constant 2 : i32
      %90 = arith.muli %c2_i32_74, %arg14 : i32
      %c2_i32_75 = arith.constant 2 : i32
      %91 = arith.addi %90, %c2_i32_75 : i32
      %92 = arith.index_cast %91 : i32 to index
      %c2_76 = arith.constant 2 : index
      %c0_77 = arith.constant 0 : index
      %93 = vector.load %arg13[%92, %c2_76, %c0_77] : memref<15x15x64xf32, #tpu.memory_space<vmem>>, vector<1x13x64xf32>
      %94 = vector.shape_cast %93 : vector<1x13x64xf32> to vector<13x64xf32>
      %95 = arith.truncf %94 : vector<13x64xf32> to vector<13x64xbf16>
      %c8 = arith.constant 8 : index
      %c0_78 = arith.constant 0 : index
      %c0_79 = arith.constant 0 : index
      %96 = vector.load %arg4[%c8, %c0_78, %c0_79] : memref<9x64x64xbf16, #tpu.memory_space<vmem>>, vector<1x64x64xbf16>
      %97 = vector.shape_cast %96 : vector<1x64x64xbf16> to vector<64x64xbf16>
      %cst_80 = arith.constant dense<0.000000e+00> : vector<13x64xf32>
      %98 = tpu.matmul %95, %97, %cst_80 {dimension_numbers = #tpu.dot_dimension_numbers<[1], [0], [0], [1], [0, 0, 1, 1], [], []>} : vector<13x64xbf16>, vector<64x64xbf16>, vector<13x64xf32> -> vector<13x64xf32>
      %99 = arith.addf %89, %98 : vector<13x64xf32>
      %cst_81 = arith.constant dense<0.000000e+00> : vector<7x64xf32>
      %100 = tpu.matmul %6, %99, %cst_81 {dimension_numbers = #tpu.dot_dimension_numbers<[1], [0], [0], [1], [0, 0, 1, 1], [], []>} : vector<7x13xf32>, vector<13x64xf32>, vector<7x64xf32> -> vector<7x64xf32>
      %101 = vector.broadcast %7 : vector<1x64xf32> to vector<7x64xf32>
      %102 = arith.addf %100, %101 : vector<7x64xf32>
      %cst_82 = arith.constant 0.000000e+00 : f32
      %103 = vector.broadcast %cst_82 : f32 to vector<7x64xf32>
      %104 = arith.maximumf %102, %103 : vector<7x64xf32>
      %105 = arith.truncf %104 : vector<7x64xf32> to vector<7x64xbf16>
      %c0_83 = arith.constant 0 : index
      %106 = arith.index_cast %arg14 : i32 to index
      %c0_84 = arith.constant 0 : index
      %c0_85 = arith.constant 0 : index
      %107 = vector.load %arg11[%c0_83, %106, %c0_84, %c0_85] : memref<1x7x7x64xbf16, #tpu.memory_space<vmem>>, vector<1x1x7x64xbf16>
      %108 = vector.shape_cast %107 : vector<1x1x7x64xbf16> to vector<7x64xbf16>
      %109 = vector.shape_cast %105 : vector<7x64xbf16> to vector<1x1x7x64xbf16>
      tpu.vector_store %arg11[%c0_83, %106, %c0_84, %c0_85], %109 {strides = array<i32>} : memref<1x7x7x64xbf16, #tpu.memory_space<vmem>>, vector<1x1x7x64xbf16>,
    }
    %c7_i32_17 = arith.constant 7 : i32
    return
  }
  func.func @transform_0(%arg0: i32) -> (i32, i32, i32, i32) {
    %c0_i32 = arith.constant 0 : i32
    %c0_i32_0 = arith.constant 0 : i32
    %c0_i32_1 = arith.constant 0 : i32
    %c0_i32_2 = arith.constant 0 : i32
    return %arg0, %c0_i32, %c0_i32_0, %c0_i32_1 : i32, i32, i32, i32
  }
  func.func @transform_1(%arg0: i32) -> (i32, i32, i32) {
    %c0_i32 = arith.constant 0 : i32
    %c0_i32_0 = arith.constant 0 : i32
    %c0_i32_1 = arith.constant 0 : i32
    %c0_i32_2 = arith.constant 0 : i32
    return %c0_i32, %c0_i32_0, %c0_i32_1 : i32, i32, i32
  }
  func.func @transform_2(%arg0: i32) -> (i32, i32, i32) {
    %c0_i32 = arith.constant 0 : i32
    %c0_i32_0 = arith.constant 0 : i32
    %c0_i32_1 = arith.constant 0 : i32
    %c0_i32_2 = arith.constant 0 : i32
    return %c0_i32, %c0_i32_0, %c0_i32_1 : i32, i32, i32
  }
  func.func @transform_3(%arg0: i32) -> (i32, i32, i32) {
    %c0_i32 = arith.constant 0 : i32
    %c0_i32_0 = arith.constant 0 : i32
    %c0_i32_1 = arith.constant 0 : i32
    %c0_i32_2 = arith.constant 0 : i32
    return %c0_i32, %c0_i32_0, %c0_i32_1 : i32, i32, i32
  }
  func.func @transform_4(%arg0: i32) -> (i32, i32) {
    %c0_i32 = arith.constant 0 : i32
    %c0_i32_0 = arith.constant 0 : i32
    %c0_i32_1 = arith.constant 0 : i32
    return %c0_i32, %c0_i32_0 : i32, i32
  }
  func.func @transform_5(%arg0: i32) -> (i32, i32) {
    %c0_i32 = arith.constant 0 : i32
    %c0_i32_0 = arith.constant 0 : i32
    %c0_i32_1 = arith.constant 0 : i32
    return %c0_i32, %c0_i32_0 : i32, i32
  }
  func.func @transform_6(%arg0: i32) -> (i32, i32) {
    %c0_i32 = arith.constant 0 : i32
    %c0_i32_0 = arith.constant 0 : i32
    %c0_i32_1 = arith.constant 0 : i32
    return %c0_i32, %c0_i32_0 : i32, i32
  }
  func.func @transform_7(%arg0: i32) -> (i32, i32) {
    %c0_i32 = arith.constant 0 : i32
    %c0_i32_0 = arith.constant 0 : i32
    %c0_i32_1 = arith.constant 0 : i32
    return %c0_i32, %c0_i32_0 : i32, i32
  }
  func.func @transform_8(%arg0: i32) -> (i32, i32) {
    %c0_i32 = arith.constant 0 : i32
    %c0_i32_0 = arith.constant 0 : i32
    %c0_i32_1 = arith.constant 0 : i32
    return %c0_i32, %c0_i32_0 : i32, i32
  }
  func.func @transform_9(%arg0: i32) -> (i32, i32) {
    %c0_i32 = arith.constant 0 : i32
    %c0_i32_0 = arith.constant 0 : i32
    %c0_i32_1 = arith.constant 0 : i32
    return %c0_i32, %c0_i32_0 : i32, i32
  }
  func.func @transform_10(%arg0: i32) -> (i32, i32, i32, i32) {
    %c0_i32 = arith.constant 0 : i32
    %c0_i32_0 = arith.constant 0 : i32
    %c0_i32_1 = arith.constant 0 : i32
    %c0_i32_2 = arith.constant 0 : i32
    return %arg0, %c0_i32, %c0_i32_0, %c0_i32_1 : i32, i32, i32, i32
  }
}

</mosaic_0001>

<bundles_post_ra>
// kernel: state_representation_forward.3
= control target key start
LH: loop header
LB: loop body
LE: loop exit
PB: predicated region body
PF: predicated region fallthrough
CT: control target
= control target key end

     0   :  { %v427_v27 = vlaneseq  ;;  %v3032_v35 = vmov 1966171168   ;;  %s3707_s0 = inlined_call_operand.vmem [shape: bf16[2,3136], index: 0, kind: input, shape index: {}]   ;;  %s3708_s1 = inlined_call_operand.vmem [shape: bf16[3136,32], index: 1, kind: input, shape index: {}]   ;;  %s3709_s2 = inlined_call_operand.vmem [shape: f32[1,32], index: 2, kind: input, shape index: {}]   ;;  %s3710_s3 = inlined_call_operand.hbm [shape: f32[2,32], index: 3, kind: output, shape index: {}]  }
   0x1   :  { %v2809_v0 = vld [vmem:[%s3708_s1 + $0x40] sm:$0xff]   ;;  %v2813_v4 = vld [vmem:[%s3708_s1 + $0x48] sm:$0xff]   ;;  %v2817_v8 = vld [vmem:[%s3708_s1 + $0x50] sm:$0xff]   ;;  %v425_v36 = vunpack.c.l.s4 %v3032_v35 }
   0x2   :  { %v2810_v1 = vld [vmem:[%s3708_s1] sm:$0xff]   ;;  %2524 = vmatprep.subr.bf16.mxu0 %v2809_v0  ;;  %v2814_v5 = vld [vmem:[%s3708_s1 + $0x8] sm:$0xff]   ;;  %v2818_v9 = vld [vmem:[%s3708_s1 + $0x10] sm:$0xff]   ;;  %v428_v32 = vshrl.u32 %v427_v27, 7 }
   0x3   :  { %v2811_v2 = vld [vmem:[%s3708_s1 + $0xc0] sm:$0xff]   ;;  %2525 = vmatpush3.bf16.msra.mxu0 %v2810_v1  ;;  %v2815_v6 = vld [vmem:[%s3708_s1 + $0xc8] sm:$0xff]   ;;  %v2819_v10 = vld [vmem:[%s3708_s1 + $0xd0] sm:$0xff]   ;;  %v426_v39 = vunpack.c.0.s8 %v425_v36 }
   0x4   :  { %v2812_v3 = vld [vmem:[%s3708_s1 + $0x80] sm:$0xff]   ;;  %2546 = vmatprep.subr.bf16.mxu1 %v2811_v2  ;;  %2526 = vmatprep.subr.bf16.mxu0 %v2813_v4  ;;  %v2816_v7 = vld [vmem:[%s3708_s1 + $0x88] sm:$0xff]   ;;  %v2820_v11 = vld [vmem:[%s3708_s1 + $0x90] sm:$0xff]  }
   0x5   :  { %2547 = vmatpush3.bf16.msra.mxu1 %v2812_v3  ;;  %v2821_v12 = vld [vmem:[%s3708_s1 + $0x58] sm:$0xff]   ;;  %v2825_v16 = vld [vmem:[%s3708_s1 + $0x60] sm:$0xff]   ;;  %v2829_v20 = vld [vmem:[%s3708_s1 + $0x68] sm:$0xff]   ;;  %v3161_v41 = vsub.s32 %v426_v39, %v428_v32 }
   0x6   :  { %2548 = vmatprep.subr.bf16.mxu1 %v2815_v6  ;;  %v2822_v13 = vld [vmem:[%s3708_s1 + $0x18] sm:$0xff]   ;;  %v2826_v17 = vld [vmem:[%s3708_s1 + $0x20] sm:$0xff]   ;;  %v2830_v21 = vld [vmem:[%s3708_s1 + $0x28] sm:$0xff]  }
   0x7   :  { %2527 = vmatpush3.bf16.msra.mxu0 %v2814_v5  ;;  %v2823_v14 = vld [vmem:[%s3708_s1 + $0xd8] sm:$0xff]   ;;  %v2827_v18 = vld [vmem:[%s3708_s1 + $0xe0] sm:$0xff]   ;;  %v2831_v22 = vld [vmem:[%s3708_s1 + $0xe8] sm:$0xff]  }
   0x8   :  { %2528 = vmatprep.subr.bf16.mxu0 %v2817_v8  ;;  %v2824_v15 = vld [vmem:[%s3708_s1 + $0x98] sm:$0xff]   ;;  %v2828_v19 = vld [vmem:[%s3708_s1 + $0xa0] sm:$0xff]   ;;  %v2832_v23 = vld [vmem:[%s3708_s1 + $0xa8] sm:$0xff]  }
   0x9   :  { %2549 = vmatpush3.bf16.msra.mxu1 %v2816_v7  ;;  %v2833_v24 = vld [vmem:[%s3708_s1 + $0x70] sm:$0xff]   ;;  %v2837_v29 = vld [vmem:[%s3708_s1 + $0x78] sm:$0xff]   ;;  %v16_v33 = vld [vmem:[%s3707_s0] sm:$0xff] }
   0xa   :  { %2550 = vmatprep.subr.bf16.mxu1 %v2819_v10  ;;  %v2834_v25 = vld [vmem:[%s3708_s1 + $0x30] sm:$0xff]   ;;  %v2838_v30 = vld [vmem:[%s3708_s1 + $0x38] sm:$0xff]   ;;  %v2842_v37 = vld [vmem:[%s3708_s1 + $0x140] sm:$0xff]   ;;  %v423_v38 = vcombine.high %v16_v33, %v16_v33  ;;  %v430_v42 = vrot.slane %v16_v33, %v3161_v41 }
   0xb   :  { %2529 = vmatpush3.bf16.msra.mxu0 %v2818_v9  ;;  %v2835_v26 = vld [vmem:[%s3708_s1 + $0xf0] sm:$0xff]   ;;  %v2839_v31 = vld [vmem:[%s3708_s1 + $0xf8] sm:$0xff]   ;;  %v2844_v40 = vld [vmem:[%s3708_s1 + $0x1c0] sm:$0xff]  }
   0xc   :  { %2530 = vmatprep.subr.bf16.mxu0 %v2821_v12  ;;  %v2836_v28 = vld [vmem:[%s3708_s1 + $0xb0] sm:$0xff]   ;;  %v2841_v34 = vld [vmem:[%s3708_s1 + $0xb8] sm:$0xff]   ;;  %v3165_v43 = vrot.slane %v423_v38, %v3161_v41  ;;  %v438_v44 = vcombine.high %v430_v42, %v430_v42  ;;  %v446_v45 = vrot.slane %v430_v42, %v3161_v41  ;;  %v2843_v48 = vld [vmem:[%s3708_s1 + $0x100] sm:$0xff]  }
   0xd   :  { %2551 = vmatpush3.bf16.msra.mxu1 %v2820_v11  ;;  %v2846_v51 = vld [vmem:[%s3708_s1 + $0x148] sm:$0xff]   ;;  %v2845_v53 = vld [vmem:[%s3708_s1 + $0x180] sm:$0xff]   ;;  %v2850_v57 = vld [vmem:[%s3708_s1 + $0x150] sm:$0xff]  }
   0xe   :  { %2552 = vmatprep.subr.bf16.mxu1 %v2823_v14  ;;  %v439_v46 = vcombine.high %v3165_v43, %v3165_v43  ;;  %v460_v47 = vrot.slane %v438_v44, %v3161_v41  ;;  %v468_v50 = vcombine.high %v446_v45, %v446_v45  ;;  %v2848_v54 = vld [vmem:[%s3708_s1 + $0x1c8] sm:$0xff]   ;;  %v2852_v59 = vld [vmem:[%s3708_s1 + $0x1d0] sm:$0xff]   ;;  %v2854_v61 = vld [vmem:[%s3708_s1 + $0x158] sm:$0xff]  }
   0xf   :  { %2531 = vmatpush3.bf16.msra.mxu0 %v2822_v13  ;;  %v2847_v56 = vld [vmem:[%s3708_s1 + $0x108] sm:$0xff]   ;;  %v2851_v60 = vld [vmem:[%s3708_s1 + $0x110] sm:$0xff]   ;;  %v2856_v63 = vld [vmem:[%s3708_s1 + $0x1d8] sm:$0xff]  }
  0x10   :  { %2532 = vmatprep.subr.bf16.mxu0 %v2825_v16  ;;  %v467_v49 = vrot.slane %v439_v46, %v3161_v41  ;;  %1820 = vmatprep.mubr.bf16.mxu0 %v460_v47  ;;  %v470_v52 = vcombine.high %v460_v47, %v460_v47  ;;  %v2849_v58 = vld [vmem:[%s3708_s1 + $0x188] sm:$0xff]   ;;  %v2853_v62 = vld [vmem:[%s3708_s1 + $0x190] sm:$0xff]   ;;  %v2855_v0 = vld [vmem:[%s3708_s1 + $0x118] sm:$0xff]  }
  0x11   :  { %2553 = vmatpush3.bf16.msra.mxu1 %v2824_v15  ;;  %v2858_v1 = vld [vmem:[%s3708_s1 + $0x160] sm:$0xff]   ;;  %v2857_v2 = vld [vmem:[%s3708_s1 + $0x198] sm:$0xff]   ;;  %v2862_v5 = vld [vmem:[%s3708_s1 + $0x168] sm:$0xff]  }
  0x12   :  { %2554 = vmatprep.subr.bf16.mxu1 %v2827_v18  ;;  %v471_v55 = vcombine.high %v467_v49, %v467_v49  ;;  %1860 = vmatprep.mubr.bf16.mxu1 %v470_v52  ;;  %v2860_v3 = vld [vmem:[%s3708_s1 + $0x1e0] sm:$0xff]   ;;  %v2864_v7 = vld [vmem:[%s3708_s1 + $0x1e8] sm:$0xff]   ;;  %v2866_v9 = vld [vmem:[%s3708_s1 + $0x170] sm:$0xff]  }
  0x13   :  { %2533 = vmatpush3.bf16.msra.mxu0 %v2826_v17  ;;  %v2859_v4 = vld [vmem:[%s3708_s1 + $0x120] sm:$0xff]   ;;  %v2863_v8 = vld [vmem:[%s3708_s1 + $0x128] sm:$0xff]   ;;  %v2868_v11 = vld [vmem:[%s3708_s1 + $0x1f0] sm:$0xff]   ;;  %v453_v17 = vrot.slane %v3165_v43, %v3161_v41 }
  0x14   :  { %2534 = vmatprep.subr.bf16.mxu0 %v2829_v20  ;;  %v2861_v6 = vld [vmem:[%s3708_s1 + $0x1a0] sm:$0xff]   ;;  %v2865_v10 = vld [vmem:[%s3708_s1 + $0x1a8] sm:$0xff]   ;;  %v2867_v12 = vld [vmem:[%s3708_s1 + $0x130] sm:$0xff]  }
  0x15   :  { %2555 = vmatpush3.bf16.msra.mxu1 %v2828_v19  ;;  %v2870_v13 = vld [vmem:[%s3708_s1 + $0x178] sm:$0xff]   ;;  %v2869_v14 = vld [vmem:[%s3708_s1 + $0x1b0] sm:$0xff]   ;;  %v2874_v18 = vld [vmem:[%s3708_s1 + $0x240] sm:$0xff]  }
  0x16   :  { %2556 = vmatprep.subr.bf16.mxu1 %v2831_v22  ;;  %v2872_v15 = vld [vmem:[%s3708_s1 + $0x1f8] sm:$0xff]   ;;  %v2876_v20 = vld [vmem:[%s3708_s1 + $0x2c0] sm:$0xff]   ;;  %v469_v22 = vcombine.high %v453_v17, %v453_v17  ;;  %v2882_v27 = vld [vmem:[%s3708_s1 + $0x250] sm:$0xff]  }
  0x17   :  { %2535 = vmatpush3.bf16.msra.mxu0 %v2830_v21  ;;  %v2871_v16 = vld [vmem:[%s3708_s1 + $0x138] sm:$0xff]   ;;  %v2875_v21 = vld [vmem:[%s3708_s1 + $0x200] sm:$0xff]   ;;  %v2885_v32 = vld [vmem:[%s3708_s1 + $0x290] sm:$0xff]  }
  0x18   :  { %2536 = vmatprep.subr.bf16.mxu0 %v2833_v24  ;;  %v2873_v19 = vld [vmem:[%s3708_s1 + $0x1b8] sm:$0xff]   ;;  %v2877_v24 = vld [vmem:[%s3708_s1 + $0x280] sm:$0xff]   ;;  %v2894_v39 = vld [vmem:[%s3708_s1 + $0x268] sm:$0xff]  }
  0x19   :  { %2557 = vmatpush3.bf16.msra.mxu1 %v2832_v23  ;;  %v2878_v23 = vld [vmem:[%s3708_s1 + $0x248] sm:$0xff]   ;;  %v2888_v33 = vld [vmem:[%s3708_s1 + $0x2d8] sm:$0xff]   ;;  %v2890_v35 = vld [vmem:[%s3708_s1 + $0x260] sm:$0xff]  }
  0x1a   :  { %2558 = vmatprep.subr.bf16.mxu1 %v2835_v26  ;;  %v2879_v26 = vld [vmem:[%s3708_s1 + $0x208] sm:$0xff]   ;;  %v2889_v36 = vld [vmem:[%s3708_s1 + $0x298] sm:$0xff]   ;;  %v2891_v38 = vld [vmem:[%s3708_s1 + $0x220] sm:$0xff]  }
  0x1b   :  { %2537 = vmatpush3.bf16.msra.mxu0 %v2834_v25  ;;  %v2880_v25 = vld [vmem:[%s3708_s1 + $0x2c8] sm:$0xff]   ;;  %v2898_v44 = vld [vmem:[%s3708_s1 + $0x270] sm:$0xff]  }
  0x1c   :  { %2538 = vmatprep.subr.bf16.mxu0 %v2837_v29  ;;  %v2884_v29 = vld [vmem:[%s3708_s1 + $0x2d0] sm:$0xff]   ;;  %v2896_v42 = vld [vmem:[%s3708_s1 + $0x2e8] sm:$0xff]  }
  0x1d   :  { %2559 = vmatpush3.bf16.msra.mxu1 %v2836_v28  ;;  %v2881_v28 = vld [vmem:[%s3708_s1 + $0x288] sm:$0xff]  }
  0x1e   :  { %2560 = vmatprep.subr.bf16.mxu1 %v2839_v31  ;;  %v2886_v31 = vld [vmem:[%s3708_s1 + $0x258] sm:$0xff]   ;;  %v2895_v43 = vld [vmem:[%s3708_s1 + $0x228] sm:$0xff]  }
  0x1f   :  { %2539 = vmatpush3.bf16.msra.mxu0 %v2838_v30  ;;  %v2883_v30 = vld [vmem:[%s3708_s1 + $0x210] sm:$0xff]   ;;  %v2897_v46 = vld [vmem:[%s3708_s1 + $0x2a8] sm:$0xff]  }
  0x20   :  { %2568 = vmatprep.subr.bf16.mxu0 %v2842_v37  ;;  %v2892_v37 = vld [vmem:[%s3708_s1 + $0x2e0] sm:$0xff]  }
  0x21   :  { %2561 = vmatpush3.bf16.msra.mxu1 %v2841_v34  ;;  %v2887_v34 = vld [vmem:[%s3708_s1 + $0x218] sm:$0xff]  }
  0x22   :  { %2590 = vmatprep.subr.bf16.mxu1 %v2844_v40  ;;  %1821 = vmatmul.mubr.bf16.vlgmr.msra.gmra.mrb[0].mxu0 %v446_v45  ;;  %v2893_v40 = vld [vmem:[%s3708_s1 + $0x2a0] sm:$0xff]   ;;  %v17_v45 = vld [vmem:[%s3707_s0 + $0x8] sm:$0xff] }
  0x23   :  { %2569 = vmatpush3.bf16.msra.mxu0 %v2843_v48  ;;  %1900 = vmatprep.mubr.bf16.mxu0 %v467_v49  ;;  %v479_v47 = vrot.slane %v17_v45, %v3161_v41  ;;  %v472_v48 = vcombine.high %v17_v45, %v17_v45  ;;  %v2900_v49 = vld [vmem:[%s3708_s1 + $0x2f0] sm:$0xff]  }
  0x24   :  { %1861 = vmatmul.mubr.bf16.vlgmr.msra.gmra.mrb[0].mxu1 %v468_v50  ;;  %2570 = vmatprep.subr.bf16.mxu0 %v2846_v51  ;;  %v2899_v50 = vld [vmem:[%s3708_s1 + $0x230] sm:$0xff]  }
  0x25   :  { %2591 = vmatpush3.bf16.msra.mxu1 %v2845_v53  ;;  %1940 = vmatprep.mubr.bf16.mxu1 %v471_v55  ;;  %v487_v51 = vcombine.high %v479_v47, %v479_v47  ;;  %v3350_v52 = vrot.slane %v472_v48, %v3161_v41  ;;  %v2902_v53 = vld [vmem:[%s3708_s1 + $0x278] sm:$0xff]   ;;  %v2949_v45 = vld [vmem:[%s3708_s1 + $0x4d0] sm:$0xff]  }
  0x26   :  { %2592 = vmatprep.subr.bf16.mxu1 %v2848_v54  ;;  %v2901_v54 = vld [vmem:[%s3708_s1 + $0x2b0] sm:$0xff]  }
  0x27   :  { %2571 = vmatpush3.bf16.msra.mxu0 %v2847_v56  ;;  %v509_v55 = vrot.slane %v487_v51, %v3161_v41  ;;  %v488_v56 = vcombine.high %v3350_v52, %v3350_v52  ;;  %v2950_v48 = vld [vmem:[%s3708_s1 + $0x490] sm:$0xff]   ;;  %v2955_v51 = vld [vmem:[%s3708_s1 + $0x460] sm:$0xff]  }
  0x28   :  { %2572 = vmatprep.subr.bf16.mxu0 %v2850_v57  ;;  %v2904_v57 = vld [vmem:[%s3708_s1 + $0x2f8] sm:$0xff]  }
  0x29   :  { %2593 = vmatpush3.bf16.msra.mxu1 %v2849_v58  ;;  %v2903_v58 = vld [vmem:[%s3708_s1 + $0x238] sm:$0xff]  }
  0x2a   :  { %2594 = vmatprep.subr.bf16.mxu1 %v2852_v59  ;;  %v519_v59 = vcombine.high %v509_v55, %v509_v55 }
  0x2b   :  { %2573 = vmatpush3.bf16.msra.mxu0 %v2851_v60  ;;  %v495_v60 = vrot.slane %v479_v47, %v3161_v41  ;;  %v2951_v47 = vld [vmem:[%s3708_s1 + $0x458] sm:$0xff]  }
  0x2c   :  { %2574 = vmatprep.subr.bf16.mxu0 %v2854_v61  ;;  %v2906_v61 = vld [vmem:[%s3708_s1 + $0x340] sm:$0xff]  }
  0x2d   :  { %2595 = vmatpush3.bf16.msra.mxu1 %v2853_v62  ;;  %v2905_v62 = vld [vmem:[%s3708_s1 + $0x2b8] sm:$0xff]  }
  0x2e   :  { %2596 = vmatprep.subr.bf16.mxu1 %v2856_v63  ;;  %v516_v63 = vrot.slane %v488_v56, %v3161_v41  ;;  %v2958_v56 = vld [vmem:[%s3708_s1 + $0x4a0] sm:$0xff]  }
  0x2f   :  { %2575 = vmatpush3.bf16.msra.mxu0 %v2855_v0  ;;  %v2908_v0 = vld [vmem:[%s3708_s1 + $0x3c0] sm:$0xff]  }
  0x30   :  { %2576 = vmatprep.subr.bf16.mxu0 %v2858_v1  ;;  %v2907_v1 = vld [vmem:[%s3708_s1 + $0x300] sm:$0xff]  }
  0x31   :  { %2597 = vmatpush3.bf16.msra.mxu1 %v2857_v2  ;;  %v517_v2 = vcombine.high %v495_v60, %v495_v60 }
  0x32   :  { %2598 = vmatprep.subr.bf16.mxu1 %v2860_v3  ;;  %v2910_v3 = vld [vmem:[%s3708_s1 + $0x348] sm:$0xff]  }
  0x33   :  { %2577 = vmatpush3.bf16.msra.mxu0 %v2859_v4  ;;  %v2909_v4 = vld [vmem:[%s3708_s1 + $0x380] sm:$0xff]  }
  0x34   :  { %2578 = vmatprep.subr.bf16.mxu0 %v2862_v5  ;;  %v520_v5 = vcombine.high %v516_v63, %v516_v63 }
  0x35   :  { %2599 = vmatpush3.bf16.msra.mxu1 %v2861_v6  ;;  %v2912_v6 = vld [vmem:[%s3708_s1 + $0x3c8] sm:$0xff]  }
  0x36   :  { %2600 = vmatprep.subr.bf16.mxu1 %v2864_v7  ;;  %v2911_v7 = vld [vmem:[%s3708_s1 + $0x308] sm:$0xff]  }
  0x37   :  { %2579 = vmatpush3.bf16.msra.mxu0 %v2863_v8  ;;  %v2914_v8 = vld [vmem:[%s3708_s1 + $0x350] sm:$0xff]  }
  0x38   :  { %2580 = vmatprep.subr.bf16.mxu0 %v2866_v9  ;;  %v2913_v9 = vld [vmem:[%s3708_s1 + $0x388] sm:$0xff]  }
  0x39   :  { %2601 = vmatpush3.bf16.msra.mxu1 %v2865_v10  ;;  %v2916_v10 = vld [vmem:[%s3708_s1 + $0x3d0] sm:$0xff]  }
  0x3a   :  { %2602 = vmatprep.subr.bf16.mxu1 %v2868_v11  ;;  %v2915_v11 = vld [vmem:[%s3708_s1 + $0x310] sm:$0xff]  }
  0x3b   :  { %2581 = vmatpush3.bf16.msra.mxu0 %v2867_v12  ;;  %v2918_v12 = vld [vmem:[%s3708_s1 + $0x358] sm:$0xff]  }
  0x3c   :  { %2582 = vmatprep.subr.bf16.mxu0 %v2870_v13  ;;  %v2917_v13 = vld [vmem:[%s3708_s1 + $0x390] sm:$0xff]  }
  0x3d   :  { %2603 = vmatpush3.bf16.msra.mxu1 %v2869_v14  ;;  %v2920_v14 = vld [vmem:[%s3708_s1 + $0x3d8] sm:$0xff]  }
  0x3e   :  { %2604 = vmatprep.subr.bf16.mxu1 %v2872_v15  ;;  %v2919_v15 = vld [vmem:[%s3708_s1 + $0x318] sm:$0xff]  }
  0x3f   :  { %2583 = vmatpush3.bf16.msra.mxu0 %v2871_v16  ;;  %v2922_v16 = vld [vmem:[%s3708_s1 + $0x360] sm:$0xff]  }
  0x40   :  { %2612 = vmatprep.subr.bf16.mxu0 %v2874_v18  ;;  %v2924_v18 = vld [vmem:[%s3708_s1 + $0x3e0] sm:$0xff]  }
  0x41   :  { %2605 = vmatpush3.bf16.msra.mxu1 %v2873_v19  ;;  %v2923_v19 = vld [vmem:[%s3708_s1 + $0x320] sm:$0xff]  }
  0x42   :  { %1901 = vmatmul.mubr.bf16.vlgmr.msra.gmra.mrb[4].mxu0 %v453_v17  ;;  %2634 = vmatprep.subr.bf16.mxu1 %v2876_v20  ;;  %v2921_v17 = vld [vmem:[%s3708_s1 + $0x398] sm:$0xff]   ;;  %v2926_v20 = vld [vmem:[%s3708_s1 + $0x368] sm:$0xff]  }
  0x43   :  { %2613 = vmatpush3.bf16.msra.mxu0 %v2875_v21  ;;  %1980 = vmatprep.mubr.bf16.mxu0 %v509_v55  ;;  %v2925_v21 = vld [vmem:[%s3708_s1 + $0x3a0] sm:$0xff]   ;;  %v2959_v55 = vld [vmem:[%s3708_s1 + $0x468] sm:$0xff]  }
  0x44   :  { %1941 = vmatmul.mubr.bf16.vlgmr.msra.gmra.mrb[4].mxu1 %v469_v22  ;;  %2614 = vmatprep.subr.bf16.mxu0 %v2878_v23  ;;  %v2928_v22 = vld [vmem:[%s3708_s1 + $0x3e8] sm:$0xff]  }
  0x45   :  { %2635 = vmatpush3.bf16.msra.mxu1 %v2877_v24  ;;  %2020 = vmatprep.mubr.bf16.mxu1 %v519_v59  ;;  %v2927_v23 = vld [vmem:[%s3708_s1 + $0x328] sm:$0xff]   ;;  %v2930_v24 = vld [vmem:[%s3708_s1 + $0x370] sm:$0xff]  }
  0x46   :  { %2636 = vmatprep.subr.bf16.mxu1 %v2880_v25  ;;  %v2929_v25 = vld [vmem:[%s3708_s1 + $0x3a8] sm:$0xff]   ;;  %v2963_v59 = vld [vmem:[%s3708_s1 + $0x470] sm:$0xff]  }
  0x47   :  { %2615 = vmatpush3.bf16.msra.mxu0 %v2879_v26  ;;  %v2932_v26 = vld [vmem:[%s3708_s1 + $0x3f0] sm:$0xff]  }
  0x48   :  { %2616 = vmatprep.subr.bf16.mxu0 %v2882_v27  ;;  %v2931_v27 = vld [vmem:[%s3708_s1 + $0x330] sm:$0xff]  }
  0x49   :  { %2637 = vmatpush3.bf16.msra.mxu1 %v2881_v28  ;;  %v2934_v28 = vld [vmem:[%s3708_s1 + $0x378] sm:$0xff]  }
  0x4a   :  { %2638 = vmatprep.subr.bf16.mxu1 %v2884_v29  ;;  %v2933_v29 = vld [vmem:[%s3708_s1 + $0x3b0] sm:$0xff]  }
  0x4b   :  { %2617 = vmatpush3.bf16.msra.mxu0 %v2883_v30  ;;  %v2936_v30 = vld [vmem:[%s3708_s1 + $0x3f8] sm:$0xff]  }
  0x4c   :  { %2618 = vmatprep.subr.bf16.mxu0 %v2886_v31  ;;  %v2935_v31 = vld [vmem:[%s3708_s1 + $0x338] sm:$0xff]  }
  0x4d   :  { %2639 = vmatpush3.bf16.msra.mxu1 %v2885_v32  ;;  %v502_v32 = vrot.slane %v3350_v52, %v3161_v41  ;;  %v2954_v52 = vld [vmem:[%s3708_s1 + $0x498] sm:$0xff]  }
  0x4e   :  { %2640 = vmatprep.subr.bf16.mxu1 %v2888_v33  ;;  %v2939_v33 = vld [vmem:[%s3708_s1 + $0x440] sm:$0xff]  }
  0x4f   :  { %2619 = vmatpush3.bf16.msra.mxu0 %v2887_v34  ;;  %v2938_v34 = vld [vmem:[%s3708_s1 + $0x3b8] sm:$0xff]  }
  0x50   :  { %2620 = vmatprep.subr.bf16.mxu0 %v2890_v35  ;;  %v2941_v35 = vld [vmem:[%s3708_s1 + $0x4c0] sm:$0xff]  }
  0x51   :  { %2641 = vmatpush3.bf16.msra.mxu1 %v2889_v36  ;;  %v2940_v36 = vld [vmem:[%s3708_s1 + $0x400] sm:$0xff]  }
  0x52   :  { %2642 = vmatprep.subr.bf16.mxu1 %v2892_v37  ;;  %v518_v37 = vcombine.high %v502_v32, %v502_v32 }
  0x53   :  { %2621 = vmatpush3.bf16.msra.mxu0 %v2891_v38  ;;  %v2943_v38 = vld [vmem:[%s3708_s1 + $0x448] sm:$0xff]  }
  0x54   :  { %2622 = vmatprep.subr.bf16.mxu0 %v2894_v39  ;;  %v2942_v39 = vld [vmem:[%s3708_s1 + $0x480] sm:$0xff]  }
  0x55   :  { %2643 = vmatpush3.bf16.msra.mxu1 %v2893_v40  ;;  %v2945_v40 = vld [vmem:[%s3708_s1 + $0x4c8] sm:$0xff]  }
  0x56   :  { %2644 = vmatprep.subr.bf16.mxu1 %v2896_v42  ;;  %v2944_v42 = vld [vmem:[%s3708_s1 + $0x408] sm:$0xff]  }
  0x57   :  { %2623 = vmatpush3.bf16.msra.mxu0 %v2895_v43  ;;  %v2947_v43 = vld [vmem:[%s3708_s1 + $0x450] sm:$0xff]  }
  0x58   :  { %2624 = vmatprep.subr.bf16.mxu0 %v2898_v44  ;;  %v2946_v44 = vld [vmem:[%s3708_s1 + $0x488] sm:$0xff]  }
  0x59   :  { %2645 = vmatpush3.bf16.msra.mxu1 %v2897_v46  ;;  %v2948_v46 = vld [vmem:[%s3708_s1 + $0x410] sm:$0xff]  }
  0x5a   :  { %2646 = vmatprep.subr.bf16.mxu1 %v2900_v49  ;;  %v2953_v49 = vld [vmem:[%s3708_s1 + $0x4d8] sm:$0xff]  }
  0x5b   :  { %2625 = vmatpush3.bf16.msra.mxu0 %v2899_v50  ;;  %v2952_v50 = vld [vmem:[%s3708_s1 + $0x418] sm:$0xff]  }
  0x5c   :  { %2626 = vmatprep.subr.bf16.mxu0 %v2902_v53  ;;  %v2957_v53 = vld [vmem:[%s3708_s1 + $0x4e0] sm:$0xff]  }
  0x5d   :  { %2647 = vmatpush3.bf16.msra.mxu1 %v2901_v54  ;;  %v2956_v54 = vld [vmem:[%s3708_s1 + $0x420] sm:$0xff]  }
  0x5e   :  { %2648 = vmatprep.subr.bf16.mxu1 %v2904_v57  ;;  %v2961_v57 = vld [vmem:[%s3708_s1 + $0x4e8] sm:$0xff]  }
  0x5f   :  { %2627 = vmatpush3.bf16.msra.mxu0 %v2903_v58  ;;  %v2960_v58 = vld [vmem:[%s3708_s1 + $0x428] sm:$0xff]  }
  0x60   :  { %2656 = vmatprep.subr.bf16.mxu0 %v2906_v61  ;;  %v2962_v61 = vld [vmem:[%s3708_s1 + $0x4a8] sm:$0xff]  }
  0x61   :  { %2649 = vmatpush3.bf16.msra.mxu1 %v2905_v62 }
  0x62   :  { %1981 = vmatmul.mubr.bf16.vlgmr.msra.gmra.mrb[8].mxu0 %v495_v60  ;;  %2678 = vmatprep.subr.bf16.mxu1 %v2908_v0  ;;  %v18_v60 = vld [vmem:[%s3707_s0 + $0x10] sm:$0xff] }
  0x63   :  { %2657 = vmatpush3.bf16.msra.mxu0 %v2907_v1  ;;  %2060 = vmatprep.mubr.bf16.mxu0 %v516_v63  ;;  %v528_v62 = vrot.slane %v18_v60, %v3161_v41  ;;  %v521_v63 = vcombine.high %v18_v60, %v18_v60  ;;  %v2965_v0 = vld [vmem:[%s3708_s1 + $0x4f0] sm:$0xff]  }
  0x64   :  { %2021 = vmatmul.mubr.bf16.vlgmr.msra.gmra.mrb[8].mxu1 %v517_v2  ;;  %2658 = vmatprep.subr.bf16.mxu0 %v2910_v3  ;;  %v2964_v1 = vld [vmem:[%s3708_s1 + $0x430] sm:$0xff]  }
  0x65   :  { %2679 = vmatpush3.bf16.msra.mxu1 %v2909_v4  ;;  %2100 = vmatprep.mubr.bf16.mxu1 %v520_v5  ;;  %v536_v2 = vcombine.high %v528_v62, %v528_v62  ;;  %v3556_v3 = vrot.slane %v521_v63, %v3161_v41  ;;  %v2967_v4 = vld [vmem:[%s3708_s1 + $0x478] sm:$0xff]   ;;  %v2966_v5 = vld [vmem:[%s3708_s1 + $0x4b0] sm:$0xff]  }
  0x66   :  { %2680 = vmatprep.subr.bf16.mxu1 %v2912_v6 }
  0x67   :  { %2659 = vmatpush3.bf16.msra.mxu0 %v2911_v7  ;;  %v558_v6 = vrot.slane %v536_v2, %v3161_v41  ;;  %v537_v7 = vcombine.high %v3556_v3, %v3556_v3 }
  0x68   :  { %2660 = vmatprep.subr.bf16.mxu0 %v2914_v8  ;;  %v2969_v8 = vld [vmem:[%s3708_s1 + $0x4f8] sm:$0xff]  }
  0x69   :  { %2681 = vmatpush3.bf16.msra.mxu1 %v2913_v9  ;;  %v2968_v9 = vld [vmem:[%s3708_s1 + $0x438] sm:$0xff]  }
  0x6a   :  { %2682 = vmatprep.subr.bf16.mxu1 %v2916_v10  ;;  %v568_v10 = vcombine.high %v558_v6, %v558_v6 }
  0x6b   :  { %2661 = vmatpush3.bf16.msra.mxu0 %v2915_v11  ;;  %v544_v11 = vrot.slane %v528_v62, %v3161_v41 }
  0x6c   :  { %2662 = vmatprep.subr.bf16.mxu0 %v2918_v12  ;;  %v2971_v12 = vld [vmem:[%s3708_s1 + $0x540] sm:$0xff]  }
  0x6d   :  { %2683 = vmatpush3.bf16.msra.mxu1 %v2917_v13  ;;  %v2970_v13 = vld [vmem:[%s3708_s1 + $0x4b8] sm:$0xff]  }
  0x6e   :  { %2684 = vmatprep.subr.bf16.mxu1 %v2920_v14  ;;  %v565_v14 = vrot.slane %v537_v7, %v3161_v41 }
  0x6f   :  { %2663 = vmatpush3.bf16.msra.mxu0 %v2919_v15  ;;  %v2973_v15 = vld [vmem:[%s3708_s1 + $0x5c0] sm:$0xff]  }
  0x70   :  { %2664 = vmatprep.subr.bf16.mxu0 %v2922_v16  ;;  %v2972_v16 = vld [vmem:[%s3708_s1 + $0x500] sm:$0xff]  }
  0x71   :  { %2685 = vmatpush3.bf16.msra.mxu1 %v2921_v17  ;;  %v566_v17 = vcombine.high %v544_v11, %v544_v11 }
  0x72   :  { %2686 = vmatprep.subr.bf16.mxu1 %v2924_v18  ;;  %v2975_v18 = vld [vmem:[%s3708_s1 + $0x548] sm:$0xff]  }
  0x73   :  { %2665 = vmatpush3.bf16.msra.mxu0 %v2923_v19  ;;  %v2974_v19 = vld [vmem:[%s3708_s1 + $0x580] sm:$0xff]  }
  0x74   :  { %2666 = vmatprep.subr.bf16.mxu0 %v2926_v20  ;;  %v569_v20 = vcombine.high %v565_v14, %v565_v14 }
  0x75   :  { %2687 = vmatpush3.bf16.msra.mxu1 %v2925_v21  ;;  %v2977_v21 = vld [vmem:[%s3708_s1 + $0x5c8] sm:$0xff]  }
  0x76   :  { %2688 = vmatprep.subr.bf16.mxu1 %v2928_v22  ;;  %v2976_v22 = vld [vmem:[%s3708_s1 + $0x508] sm:$0xff]  }
  0x77   :  { %2667 = vmatpush3.bf16.msra.mxu0 %v2927_v23  ;;  %v2979_v23 = vld [vmem:[%s3708_s1 + $0x550] sm:$0xff]  }
  0x78   :  { %2668 = vmatprep.subr.bf16.mxu0 %v2930_v24  ;;  %v2978_v24 = vld [vmem:[%s3708_s1 + $0x588] sm:$0xff]  }
  0x79   :  { %2689 = vmatpush3.bf16.msra.mxu1 %v2929_v25  ;;  %v2981_v25 = vld [vmem:[%s3708_s1 + $0x5d0] sm:$0xff]  }
  0x7a   :  { %2690 = vmatprep.subr.bf16.mxu1 %v2932_v26  ;;  %v2980_v26 = vld [vmem:[%s3708_s1 + $0x510] sm:$0xff]  }
  0x7b   :  { %2669 = vmatpush3.bf16.msra.mxu0 %v2931_v27  ;;  %v2983_v27 = vld [vmem:[%s3708_s1 + $0x558] sm:$0xff]  }
  0x7c   :  { %2670 = vmatprep.subr.bf16.mxu0 %v2934_v28  ;;  %v2982_v28 = vld [vmem:[%s3708_s1 + $0x590] sm:$0xff]  }
  0x7d   :  { %2691 = vmatpush3.bf16.msra.mxu1 %v2933_v29  ;;  %v2985_v29 = vld [vmem:[%s3708_s1 + $0x5d8] sm:$0xff]  }
  0x7e   :  { %2692 = vmatprep.subr.bf16.mxu1 %v2936_v30  ;;  %v2984_v30 = vld [vmem:[%s3708_s1 + $0x518] sm:$0xff]  }
  0x7f   :  { %2671 = vmatpush3.bf16.msra.mxu0 %v2935_v31  ;;  %v2987_v31 = vld [vmem:[%s3708_s1 + $0x560] sm:$0xff]  }
  0x80   :  { %2700 = vmatprep.subr.bf16.mxu0 %v2939_v33  ;;  %v2989_v33 = vld [vmem:[%s3708_s1 + $0x5e0] sm:$0xff]  }
  0x81   :  { %2693 = vmatpush3.bf16.msra.mxu1 %v2938_v34  ;;  %v2988_v34 = vld [vmem:[%s3708_s1 + $0x520] sm:$0xff]  }
  0x82   :  { %2061 = vmatmul.mubr.bf16.vlgmr.msra.gmra.mrb[12].mxu0 %v502_v32  ;;  %2722 = vmatprep.subr.bf16.mxu1 %v2941_v35  ;;  %v2986_v32 = vld [vmem:[%s3708_s1 + $0x598] sm:$0xff]   ;;  %v2991_v35 = vld [vmem:[%s3708_s1 + $0x568] sm:$0xff]  }
  0x83   :  { %2701 = vmatpush3.bf16.msra.mxu0 %v2940_v36  ;;  %2140 = vmatprep.mubr.bf16.mxu0 %v558_v6  ;;  %v2990_v36 = vld [vmem:[%s3708_s1 + $0x5a0] sm:$0xff]  }
  0x84   :  { %2101 = vmatmul.mubr.bf16.vlgmr.msra.gmra.mrb[12].mxu1 %v518_v37  ;;  %2702 = vmatprep.subr.bf16.mxu0 %v2943_v38  ;;  %v2993_v37 = vld [vmem:[%s3708_s1 + $0x5e8] sm:$0xff]  }
  0x85   :  { %2723 = vmatpush3.bf16.msra.mxu1 %v2942_v39  ;;  %2180 = vmatprep.mubr.bf16.mxu1 %v568_v10  ;;  %v2992_v38 = vld [vmem:[%s3708_s1 + $0x528] sm:$0xff]   ;;  %v2995_v39 = vld [vmem:[%s3708_s1 + $0x570] sm:$0xff]  }
  0x86   :  { %2724 = vmatprep.subr.bf16.mxu1 %v2945_v40  ;;  %v2994_v40 = vld [vmem:[%s3708_s1 + $0x5a8] sm:$0xff]  }
  0x87   :  { %2703 = vmatpush3.bf16.msra.mxu0 %v2944_v42  ;;  %v2997_v42 = vld [vmem:[%s3708_s1 + $0x5f0] sm:$0xff]  }
  0x88   :  { %2704 = vmatprep.subr.bf16.mxu0 %v2947_v43  ;;  %v2996_v43 = vld [vmem:[%s3708_s1 + $0x530] sm:$0xff]  }
  0x89   :  { %2725 = vmatpush3.bf16.msra.mxu1 %v2946_v44  ;;  %v2999_v44 = vld [vmem:[%s3708_s1 + $0x578] sm:$0xff]  }
  0x8a   :  { %2726 = vmatprep.subr.bf16.mxu1 %v2949_v45  ;;  %v2998_v45 = vld [vmem:[%s3708_s1 + $0x5b0] sm:$0xff]  }
  0x8b   :  { %2705 = vmatpush3.bf16.msra.mxu0 %v2948_v46  ;;  %v3001_v46 = vld [vmem:[%s3708_s1 + $0x5f8] sm:$0xff]  }
  0x8c   :  { %2706 = vmatprep.subr.bf16.mxu0 %v2951_v47  ;;  %v3000_v47 = vld [vmem:[%s3708_s1 + $0x538] sm:$0xff]  }
  0x8d   :  { %2727 = vmatpush3.bf16.msra.mxu1 %v2950_v48 }
  0x8e   :  { %2728 = vmatprep.subr.bf16.mxu1 %v2953_v49 }
  0x8f   :  { %2707 = vmatpush3.bf16.msra.mxu0 %v2952_v50 }
  0x90   :  { %2708 = vmatprep.subr.bf16.mxu0 %v2955_v51 }
  0x91   :  { %2729 = vmatpush3.bf16.msra.mxu1 %v2954_v52 }
  0x92   :  { %2730 = vmatprep.subr.bf16.mxu1 %v2957_v53 }
  0x93   :  { %2709 = vmatpush3.bf16.msra.mxu0 %v2956_v54 }
  0x94   :  { %2710 = vmatprep.subr.bf16.mxu0 %v2959_v55 }
  0x95   :  { %2731 = vmatpush3.bf16.msra.mxu1 %v2958_v56 }
  0x96   :  { %2732 = vmatprep.subr.bf16.mxu1 %v2961_v57 }
  0x97   :  { %2711 = vmatpush3.bf16.msra.mxu0 %v2960_v58 }
  0x98   :  { %2712 = vmatprep.subr.bf16.mxu0 %v2963_v59 }
  0x99   :  { %2733 = vmatpush3.bf16.msra.mxu1 %v2962_v61 }
  0x9a   :  { %2734 = vmatprep.subr.bf16.mxu1 %v2965_v0 }
  0x9b   :  { %2713 = vmatpush3.bf16.msra.mxu0 %v2964_v1 }
  0x9c   :  { %2714 = vmatprep.subr.bf16.mxu0 %v2967_v4 }
  0x9d   :  { %2735 = vmatpush3.bf16.msra.mxu1 %v2966_v5 }
  0x9e   :  { %2736 = vmatprep.subr.bf16.mxu1 %v2969_v8 }
  0x9f   :  { %2715 = vmatpush3.bf16.msra.mxu0 %v2968_v9 }
  0xa0   :  { %2744 = vmatprep.subr.bf16.mxu0 %v2971_v12 }
  0xa1   :  { %2737 = vmatpush3.bf16.msra.mxu1 %v2970_v13 }
  0xa2   :  { %2141 = vmatmul.mubr.bf16.vlgmr.msra.gmra.mrb[16].mxu0 %v544_v11  ;;  %2766 = vmatprep.subr.bf16.mxu1 %v2973_v15 }
  0xa3   :  { %2745 = vmatpush3.bf16.msra.mxu0 %v2972_v16  ;;  %2220 = vmatprep.mubr.bf16.mxu0 %v565_v14 }
  0xa4   :  { %2181 = vmatmul.mubr.bf16.vlgmr.msra.gmra.mrb[16].mxu1 %v566_v17  ;;  %2746 = vmatprep.subr.bf16.mxu0 %v2975_v18 }
  0xa5   :  { %2767 = vmatpush3.bf16.msra.mxu1 %v2974_v19  ;;  %2260 = vmatprep.mubr.bf16.mxu1 %v569_v20 }
  0xa6   :  { %2768 = vmatprep.subr.bf16.mxu1 %v2977_v21 }
  0xa7   :  { %2747 = vmatpush3.bf16.msra.mxu0 %v2976_v22 }
  0xa8   :  { %2748 = vmatprep.subr.bf16.mxu0 %v2979_v23 }
  0xa9   :  { %2769 = vmatpush3.bf16.msra.mxu1 %v2978_v24 }
  0xaa   :  { %2770 = vmatprep.subr.bf16.mxu1 %v2981_v25 }
  0xab   :  { %2749 = vmatpush3.bf16.msra.mxu0 %v2980_v26 }
  0xac   :  { %2750 = vmatprep.subr.bf16.mxu0 %v2983_v27 }
  0xad   :  { %2771 = vmatpush3.bf16.msra.mxu1 %v2982_v28 }
  0xae   :  { %2772 = vmatprep.subr.bf16.mxu1 %v2985_v29 }
  0xaf   :  { %2751 = vmatpush3.bf16.msra.mxu0 %v2984_v30 }
  0xb0   :  { %2752 = vmatprep.subr.bf16.mxu0 %v2987_v31 }
  0xb1   :  { %2773 = vmatpush3.bf16.msra.mxu1 %v2986_v32 }
  0xb2   :  { %2774 = vmatprep.subr.bf16.mxu1 %v2989_v33 }
  0xb3   :  { %2753 = vmatpush3.bf16.msra.mxu0 %v2988_v34 }
  0xb4   :  { %2754 = vmatprep.subr.bf16.mxu0 %v2991_v35 }
  0xb5   :  { %2775 = vmatpush3.bf16.msra.mxu1 %v2990_v36 }
  0xb6   :  { %2776 = vmatprep.subr.bf16.mxu1 %v2993_v37 }
  0xb7   :  { %2755 = vmatpush3.bf16.msra.mxu0 %v2992_v38 }
  0xb8   :  { %2756 = vmatprep.subr.bf16.mxu0 %v2995_v39 }
  0xb9   :  { %2777 = vmatpush3.bf16.msra.mxu1 %v2994_v40 }
  0xba   :  { %2778 = vmatprep.subr.bf16.mxu1 %v2997_v42 }
  0xbb   :  { %2757 = vmatpush3.bf16.msra.mxu0 %v2996_v43 }
  0xbc   :  { %8 = vsyncpa [#allocation3], 0  ;;  %2758 = vmatprep.subr.bf16.mxu0 %v2999_v44  ;;  %v551_v48 = vrot.slane %v3556_v3, %v3161_v41  ;;  %v3003_v49 = vld [vmem:[%s3708_s1 + $0x5b8] sm:$0xff]   ;;  %v3004_v50 = vld [vmem:[%s3708_s1 + $0x600] sm:$0xff]   ;;  %v3033_v51 = vmov 0.0   ;;  %vm3034_vm0 = vmmov 0  }
  0xbd   :  { %2779 = vmatpush3.bf16.msra.mxu1 %v2998_v45  ;;  %v3005_v53 = vld [vmem:[%s3708_s1 + $0x608] sm:$0xff]   ;;  %v3006_v54 = vld [vmem:[%s3708_s1 + $0x610] sm:$0xff]   ;;  %v3007_v55 = vld [vmem:[%s3708_s1 + $0x618] sm:$0xff]   ;;  %vm1784_vm1 = vcmask 523264   ;;  %vm2309_vm2 = vcmask 254976  }
  0xbe   :  { %2780 = vmatprep.subr.bf16.mxu1 %v3001_v46  ;;  %v567_v52 = vcombine.high %v551_v48, %v551_v48  ;;  %v2326_v56 = vld.sshfl [vmem:[%s3707_s0 + $0x18] sm:$0x1 pattern:$0x75316420]  ;;  %v2325_v59 = vld [vmem:[%s3709_s2] ss:$0 sm:$0xff] }
  0xbf   :  { %2759 = vmatpush3.bf16.msra.mxu0 %v3000_v47  ;;  %v583_v57 = vrot.slane %v2326_v56, %v3161_v41  ;;  %s3035_s0 = smov [#allocation2]  }
  0xc0   :  { %2793 = vmatprep.subr.bf16.mxu0 %v3033_v51  ;;  %s2317_s1 = sshll.u32 %s3035_s0, 4  ;;  %s2318_s1 = int_to_ptr.vmem [resolvable:$true] %s2317_s1 }
  0xc1   :  { %2781 = vmatpush3.bf16.msra.mxu1 %v3003_v49  ;;  %s3008_s2 = scalar_lea.vmem %s2318_s1, 32  ;;  %p3013_p1 = scmp.lt.s32.totalorder %s2318_s1, %s2318_s1 }
  0xc2   :  { %2221 = vmatmul.mubr.bf16.vlgmr.msra.gmra.mrb[20].mxu0 %v551_v48  ;;  %p3009_p0 = scmp.ne.s32.totalorder %s2318_s1, %s3008_s2  ;;  %p3014_p2 = scmp.lt.s32.totalorder %s3008_s2, %s3008_s2 }
  0xc3   :  { %2794 = vmatpush3.bf16.msra.mxu0 %v3004_v50  ;;  %2801 = vmatprep.mubr.msk.bf16.mxu0 %vm3034_vm0, %v3033_v51 }
  0xc4   :  { %2261 = vmatmul.mubr.bf16.vlgmr.msra.gmra.mrb[20].mxu1 %v567_v52  ;;  %2795 = vmatprep.subr.bf16.mxu0 %v3033_v51  ;;  %p3015_p3 = por %p3014_p2, %p3013_p1 }
  0xc6   :  { %p3016_p4 = pnand %p3015_p3, %p3009_p0 }
  0xc7   :  { %2796 = vmatpush3.bf16.msra.mxu0 %v3005_v53 }
  0xc8   :  { %2797 = vmatprep.subr.bf16.mxu0 %v3033_v51 }
  0xcb   :  { %2798 = vmatpush3.bf16.msra.mxu0 %v3006_v54 }
  0xcc   :  { %2799 = vmatprep.subr.bf16.mxu0 %v3033_v51 }
  0xcf   :  { %2800 = vmatpush3.bf16.msra.mxu0 %v3007_v55 }
  0xd2   :  { %2802 = vmatmul.mubr.msk.bf16.vlgmr.msra.gmra.mrb[24].mxu0 %vm1784_vm1, %v583_v57 }
  0xf5   :  { %v2540_v58 = vpop.f32.mrb[0].mxu0 }
  0xf6   :  { %v2541_v60 = vpop.f32.mrb[1].mxu0 }
  0xf7   :  { %v2542_v61 = vadd.f32 %v2541_v60, %v2540_v58  ;;  %v2543_v62 = vpop.f32.mrb[2].mxu0  ;;  %v2562_v63 = vpop.f32.mrb[0].mxu1 }
  0xf8   :  { %v2544_v0 = vpop.f32.mrb[3].mxu0  ;;  %v2563_v1 = vpop.f32.mrb[1].mxu1 }
  0xf9   :  { %v1823_v2 = vadd.f32 %v2542_v61, %v2325_v59  ;;  %v2564_v3 = vadd.f32 %v2563_v1, %v2562_v63  ;;  %v2565_v4 = vpop.f32.mrb[2].mxu1 }
  0xfa   :  { %v2566_v5 = vpop.f32.mrb[3].mxu1 }
  0xfb   :  { %v1863_v6 = vadd.f32 %v2564_v3, %v1823_v2 }
 0x115   :  { %v2584_v41 = vpop.f32.mrb[4].mxu0 }
 0x116   :  { %v2585_v7 = vpop.f32.mrb[5].mxu0 }
 0x117   :  { %v2586_v8 = vadd.f32 %v2585_v7, %v2584_v41  ;;  %v2587_v9 = vpop.f32.mrb[6].mxu0  ;;  %v2606_v10 = vpop.f32.mrb[4].mxu1 }
 0x118   :  { %v2588_v11 = vpop.f32.mrb[7].mxu0  ;;  %v2607_v12 = vpop.f32.mrb[5].mxu1 }
 0x119   :  { %v1903_v13 = vadd.f32 %v2586_v8, %v1863_v6  ;;  %v2608_v14 = vadd.f32 %v2607_v12, %v2606_v10  ;;  %v2609_v15 = vpop.f32.mrb[6].mxu1 }
 0x11a   :  { %v2610_v16 = vpop.f32.mrb[7].mxu1 }
 0x11b   :  { %v1943_v17 = vadd.f32 %v2608_v14, %v1903_v13 }
 0x135   :  { %v2628_v18 = vpop.f32.mrb[8].mxu0 }
 0x136   :  { %v2629_v19 = vpop.f32.mrb[9].mxu0 }
 0x137   :  { %v2630_v20 = vadd.f32 %v2629_v19, %v2628_v18  ;;  %v2631_v21 = vpop.f32.mrb[10].mxu0  ;;  %v2650_v22 = vpop.f32.mrb[8].mxu1 }
 0x138   :  { %v2632_v23 = vpop.f32.mrb[11].mxu0  ;;  %v2651_v24 = vpop.f32.mrb[9].mxu1 }
 0x139   :  { %v1983_v25 = vadd.f32 %v2630_v20, %v1943_v17  ;;  %v2652_v26 = vadd.f32 %v2651_v24, %v2650_v22  ;;  %v2653_v27 = vpop.f32.mrb[10].mxu1 }
 0x13a   :  { %v2654_v28 = vpop.f32.mrb[11].mxu1 }
 0x13b   :  { %v2023_v29 = vadd.f32 %v2652_v26, %v1983_v25 }
 0x155   :  { %v2672_v30 = vpop.f32.mrb[12].mxu0 }
 0x156   :  { %v2673_v31 = vpop.f32.mrb[13].mxu0 }
 0x157   :  { %v2674_v32 = vadd.f32 %v2673_v31, %v2672_v30  ;;  %v2675_v33 = vpop.f32.mrb[14].mxu0  ;;  %v2694_v34 = vpop.f32.mrb[12].mxu1 }
 0x158   :  { %v2676_v35 = vpop.f32.mrb[15].mxu0  ;;  %v2695_v36 = vpop.f32.mrb[13].mxu1 }
 0x159   :  { %v2063_v37 = vadd.f32 %v2674_v32, %v2023_v29  ;;  %v2696_v38 = vadd.f32 %v2695_v36, %v2694_v34  ;;  %v2697_v39 = vpop.f32.mrb[14].mxu1 }
 0x15a   :  { %v2698_v40 = vpop.f32.mrb[15].mxu1 }
 0x15b   :  { %v2103_v42 = vadd.f32 %v2696_v38, %v2063_v37 }
 0x175   :  { %v2716_v43 = vpop.f32.mrb[16].mxu0 }
 0x176   :  { %v2717_v44 = vpop.f32.mrb[17].mxu0 }
 0x177   :  { %v2718_v45 = vadd.f32 %v2717_v44, %v2716_v43  ;;  %v2719_v46 = vpop.f32.mrb[18].mxu0  ;;  %v2738_v47 = vpop.f32.mrb[16].mxu1 }
 0x178   :  { %v2720_v48 = vpop.f32.mrb[19].mxu0  ;;  %v2739_v49 = vpop.f32.mrb[17].mxu1 }
 0x179   :  { %v2143_v50 = vadd.f32 %v2718_v45, %v2103_v42  ;;  %v2740_v51 = vadd.f32 %v2739_v49, %v2738_v47  ;;  %v2741_v52 = vpop.f32.mrb[18].mxu1 }
 0x17a   :  { %v2742_v53 = vpop.f32.mrb[19].mxu1 }
 0x17b   :  { %v2183_v54 = vadd.f32 %v2740_v51, %v2143_v50 }
 0x195   :  { %v2760_v55 = vpop.f32.mrb[20].mxu0 }
 0x196   :  { %v2761_v56 = vpop.f32.mrb[21].mxu0 }
 0x197   :  { %v2762_v57 = vadd.f32 %v2761_v56, %v2760_v55  ;;  %v2763_v58 = vpop.f32.mrb[22].mxu0  ;;  %v2782_v59 = vpop.f32.mrb[20].mxu1 }
 0x198   :  { %v2764_v60 = vpop.f32.mrb[23].mxu0  ;;  %v2783_v61 = vpop.f32.mrb[21].mxu1 }
 0x199   :  { %v2223_v62 = vadd.f32 %v2762_v57, %v2183_v54  ;;  %v2784_v63 = vadd.f32 %v2783_v61, %v2782_v59  ;;  %v2785_v0 = vpop.f32.mrb[22].mxu1 }
 0x19a   :  { %v2786_v1 = vpop.f32.mrb[23].mxu1 }
 0x19b   :  { %v2263_v2 = vadd.f32 %v2784_v63, %v2223_v62 }
 0x1a5   :  { %v2302_v3 = vpop.f32.mrb[24].mxu0 }
 0x1a6   :  { %v2303_v4 = vadd.f32 %v2302_v3, %v2263_v2  ;;  %v2803_v5 = vpop.f32.mrb[25].mxu0 }
 0x1a7   :  { %v2305_v6 = vpop.f32.mrb[26].mxu0 }
 0x1a8   :  { %v2308_v41 = vmax.f32 %v2303_v4, 0.0  ;;  %v2804_v7 = vpop.f32.mrb[27].mxu0 }
 0x1aa   :  { %2310 = vst.msk [vmem:[#allocation2] sm:$0x3] %vm2309_vm2, %v2308_v41 }
 0x1ab   :  { %3019 = shalt.err (!%p3016_p4)
}
 0x1ac   :  { %s3020_s11 = scalar_lea.hbm %s3710_s3, 32 }
 0x1ad   :  { %p3021_p5 = scmp.ne.s32.totalorder %s3710_s3, %s3020_s11  ;;  %p3024_p6 = scmp.lt.u32.totalorder %s3020_s11, %s3710_s3 }
 0x1af   :  { %p3026_p7 = pnand %p3024_p6, %p3021_p5 }
 0x1b1   :  { %3029 = shalt.err (!%p3026_p7)
}
 0x1b2   :  { %2320 = dma.vmem_to_hbm [thread:$0]  %s2318_s1, 32, %s3710_s3, [#allocation3]  }
 0x1b3   :  { %3030 = dma.done.wait [#allocation3], 32  }
 0x1b4   :  { %3031 = vsyncadd [#allocation3], 4294967264 }
 0x1b5   :  { %2324 = vsyncpa [#allocation3], 1 }

// kernel: state_representation_forward.2
= control target key start
LH: loop header
LB: loop body
LE: loop exit
PB: predicated region body
PF: predicated region fallthrough
CT: control target
= control target key end

     0   :  { %s4370_s13 = smov 0   ;;  %s4965_s0 = inlined_call_operand.vmem [shape: f32[2,64,64,4], index: 0, kind: input, shape index: {}]   ;;  %s4966_s1 = inlined_call_operand.vmem [shape: bf16[9,4,32], index: 1, kind: input, shape index: {}]   ;;  %s4967_s2 = inlined_call_operand.vmem [shape: bf16[9,32,64], index: 2, kind: input, shape index: {}]   ;;  %s4968_s3 = inlined_call_operand.vmem [shape: bf16[9,64,64], index: 3, kind: input, shape index: {}]   ;;  %s4969_s4 = inlined_call_operand.vmem [shape: f32[1,32], index: 4, kind: input, shape index: {}]   ;;  %s4970_s5 = inlined_call_operand.vmem [shape: f32[1,64], index: 5, kind: input, shape index: {}]   ;;  %s4971_s6 = inlined_call_operand.vmem [shape: f32[1,64], index: 6, kind: input, shape index: {}]   ;;  %s4972_s7 = inlined_call_operand.vmem [shape: f32[31,62], index: 7, kind: input, shape index: {}]   ;;  %s4973_s8 = inlined_call_operand.vmem [shape: f32[15,29], index: 8, kind: input, shape index: {}]   ;;  %s4974_s9 = inlined_call_operand.vmem [shape: f32[7,13], index: 9, kind: input, shape index: {}]   ;;  %s4975_s10 = inlined_call_operand.vmem [shape: bf16[2,7,7,64], index: 10, kind: output, shape index: {}]  }
   0x1 LB: > { %s3203_s14 = sadd.s32 4294967295, %s4296_s13   ;;  %p3207_p0 = scmp.ge.s32.totalorder %s4296_s13, 1  ;;  %s4296_s13 = sphi %s4370_s13, %s20_s13  }
   0x2   : > { %p312_p1 = scmp.lt.s32.totalorder %s4296_s13, 3 }
   0x4   : > { %p313_p2 = pnand %p3207_p0, %p312_p1 }
   0x5   : > { %p350_p3 = scmp.lt.s32.totalorder (!%p313_p2), %s3203_s14, 1  ;;  %v4381_v0 = vld [vmem:[%s4972_s7] sm:$0xff] (!%p313_p2)  ;;  %v4386_v1 = vld [vmem:[%s4972_s7 + $0x8] sm:$0xff] (!%p313_p2)  ;;  %v4391_v2 = vld [vmem:[%s4972_s7 + $0x10] sm:$0xff] (!%p313_p2)  ;;  %s4413_s15 = smov (!%p313_p2), 0  }
   0x6   : > { %316 = sbr.rel (%p313_p2) target bundleno = 1572 (0x624), region = 60  ;;  %v4396_v3 = vld [vmem:[%s4972_s7 + $0x18] sm:$0x7f] (!%p313_p2)  ;;  %v4401_v4 = vld [vmem:[%s4969_s4] ss:$0 sm:$0xff] (!%p313_p2) }
   0xd   : > { %s4979_s14 = smov (!%p350_p3, %s3203_s14), 1 }
   0xe   : > { %s3552_s25 = sshll.u32 %s4979_s14, 12  ;;  %s4186_s26 = smul.u32 28, %s4979_s14 }
   0xf   : > { %s4406_s29 = scalar_lea.vmem %s4965_s0, %s3552_s25 }
  0x10   : > { %s4411_s12 = scalar_lea.vmem %s4975_s10, %s4186_s26 }
  0x11 LB: >> { %v3213_v5 = vld [vmem:[%s4966_s1 + $0x2] sm:$0x3]  ;;  %vm415_vm0 = vcmask 1041408   ;;  %v3250_v6 = vld [vmem:[%s4966_s1 + $0x8] sm:$0x3]  ;;  %s3553_s23 = sshll.u32 %s4300_s15, 7  ;;  %s4300_s15 = sphi %s4413_s15, %s371_s15  }
  0x12   : >> { %4177 = vmatprep.subr.msk.bf16.mxu1 %vm415_vm0, %v3213_v5  ;;  %4181 = vmatprep.subr.msk.bf16.mxu0 %vm415_vm0, %v3250_v6  ;;  %v417_v7 = vsel %vm415_vm0, %v3213_v5, 0  ;;  %v798_v8 = vsel %vm415_vm0, %v3250_v6, 0  ;;  %v3263_v9 = vld [vmem:[%s4966_s1 + $0xa] sm:$0x3]  ;;  %v387_v10 = vld [vmem:[%s4966_s1] sm:$0x3]  ;;  %s4436_s24 = scalar_lea.vmem %s4406_s29, %s3553_s23 }
  0x13   : >> { %3710 = vmatpush3.bf16.msra.mxu1 %v417_v7  ;;  %3750 = vmatpush3.bf16.msra.mxu0 %v798_v8  ;;  %v388_v11 = vld [vmem:[%s4436_s24 + $0x1] sm:$0xff]  ;;  %v389_v12 = vld [vmem:[%s4436_s24 + $0x9] sm:$0xff]  ;;  %vm402_vm1 = vcmask 31744   ;;  %v390_v16 = vld [vmem:[%s4436_s24 + $0x11] sm:$0xff]  ;;  %v497_v23 = vsel %vm415_vm0, %v387_v10, 0  ;;  %v900_v25 = vsel %vm415_vm0, %v3263_v9, 0 }
  0x14   : >> { %4182 = vmatprep.subr.msk.bf16.mxu0 %vm415_vm0, %v3263_v9  ;;  %4178 = vmatprep.subr.msk.bf16.mxu1 %vm415_vm0, %v387_v10  ;;  %v3242_v13 = vld [vmem:[%s4436_s24 + $0x41] sm:$0xff]  ;;  %v396_v14 = vpack.c.bf16 %v389_v12, %v388_v11  ;;  %v3243_v15 = vld [vmem:[%s4436_s24 + $0x49] sm:$0xff]  ;;  %v391_v17 = vld [vmem:[%s4436_s24 + $0x19] sm:$0xff]  ;;  %vm1290_vm2 = vcmask 506880   ;;  %vm1303_vm3 = vcmask 1045504   ;;  %vm4310_vm4 = vmmov 1  }
  0x15   : >> { %v779_v18 = vpack.c.bf16 %v3243_v15, %v3242_v13  ;;  %v397_v19 = vpack.c.bf16 %v391_v17, %v390_v16  ;;  %v3244_v20 = vld [vmem:[%s4436_s24 + $0x51] sm:$0xff]  ;;  %v3245_v21 = vld [vmem:[%s4436_s24 + $0x59] sm:$0xff]  ;;  %v392_v22 = vld [vmem:[%s4436_s24 + $0x21] sm:$0xff]  ;;  %s3315_s19 = sshll.u32 %s4300_s15, 5  ;;  %vm1398_vm6 = vcmask 261120   ;;  %vm1402_vm7 = vcmask 260096  }
  0x16   : >> { %3711 = vmatprep.mubr.msk.bf16.mxu1 %vm402_vm1, %v396_v14  ;;  %v780_v24 = vpack.c.bf16 %v3245_v21, %v3244_v20  ;;  %v393_v26 = vld [vmem:[%s4436_s24 + $0x29] sm:$0xff]  ;;  %v3246_v27 = vld [vmem:[%s4436_s24 + $0x61] sm:$0xff]  ;;  %v394_v33 = vld [vmem:[%s4436_s24 + $0x31] sm:$0xff]  ;;  %s1397_s20 = scalar_lea.vmem [#allocation2], %s3315_s19  ;;  %s371_s15 = sadd.s32 1, %s4300_s15  }
  0x17   : >> { %v3247_v28 = vld [vmem:[%s4436_s24 + $0x69] sm:$0xff]  ;;  %3751 = vmatprep.mubr.msk.bf16.mxu0 %vm402_vm1, %v779_v18  ;;  %3712 = vmatmul.mubr.msk.bf16.vlgmr.msra.gmra.mrb[0].mxu1 %vm402_vm1, %v397_v19  ;;  %v398_v29 = vpack.c.bf16 %v393_v26, %v392_v22  ;;  %v3222_v32 = vld [vmem:[%s4966_s1 + $0x4] sm:$0x3]  ;;  %v395_v34 = vld [vmem:[%s4436_s24 + $0x39] sm:$0x3f]  ;;  %p368_p4 = scmp.ge.s32.totalorder %s371_s15, 31  }
  0x18   : >> { %v781_v30 = vpack.c.bf16 %v3247_v28, %v3246_v27  ;;  %v3278_v31 = vld [vmem:[%s4966_s1 + $0xc] sm:$0x3]  ;;  %3752 = vmatmul.mubr.msk.bf16.vlgmr.msra.gmra.mrb[0].mxu0 %vm402_vm1, %v780_v24  ;;  %v3248_v35 = vld [vmem:[%s4436_s24 + $0x71] sm:$0xff]  ;;  %3720 = vmatpush3.bf16.msra.mxu1 %v497_v23  ;;  %v3249_v36 = vld [vmem:[%s4436_s24 + $0x79] sm:$0x3f]  ;;  %v399_v41 = vpack.c.bf16 %v395_v34, %v394_v33  ;;  %v591_v59 = vsel %vm415_vm0, %v3222_v32, 0 }
  0x19   : >> { %3760 = vmatpush3.bf16.msra.mxu0 %v900_v25  ;;  %3715 = vmatprep.mubr.msk.bf16.mxu1 %vm402_vm1, %v398_v29  ;;  %v375_v37 = vld [vmem:[%s4436_s24] sm:$0xff]  ;;  %v376_v38 = vld [vmem:[%s4436_s24 + $0x8] sm:$0xff]  ;;  %v782_v42 = vpack.c.bf16 %v3249_v36, %v3248_v35  ;;  %v377_v45 = vld [vmem:[%s4436_s24 + $0x10] sm:$0xff]  ;;  %v1005_v57 = vsel %vm415_vm0, %v3278_v31, 0  ;;  %s4609_s27 = smov (%p368_p4), 0  }
  0x1a   : >> { %3755 = vmatprep.mubr.msk.bf16.mxu0 %vm402_vm1, %v781_v30  ;;  %v3255_v39 = vld [vmem:[%s4436_s24 + $0x42] sm:$0xff]  ;;  %v3256_v40 = vld [vmem:[%s4436_s24 + $0x4a] sm:$0xff]  ;;  %4183 = vmatprep.subr.msk.bf16.mxu0 %vm415_vm0, %v3278_v31  ;;  %v383_v43 = vpack.c.bf16 %v376_v38, %v375_v37  ;;  %v378_v46 = vld [vmem:[%s4436_s24 + $0x18] sm:$0xff] }
  0x1b   : >> { %4179 = vmatprep.subr.msk.bf16.mxu1 %vm415_vm0, %v3222_v32  ;;  %v881_v44 = vpack.c.bf16 %v3256_v40, %v3255_v39  ;;  %v3257_v47 = vld [vmem:[%s4436_s24 + $0x52] sm:$0xff]  ;;  %v3258_v48 = vld [vmem:[%s4436_s24 + $0x5a] sm:$0xff]  ;;  %v380_v50 = vld [vmem:[%s4436_s24 + $0x28] sm:$0xff]  ;;  %v384_v53 = vpack.c.bf16 %v378_v46, %v377_v45 }
  0x1c   : >> { %v379_v49 = vld [vmem:[%s4436_s24 + $0x20] sm:$0xff]  ;;  %v3260_v52 = vld [vmem:[%s4436_s24 + $0x6a] sm:$0xff]  ;;  %v882_v54 = vpack.c.bf16 %v3258_v48, %v3257_v47  ;;  %v382_v61 = vld [vmem:[%s4436_s24 + $0x38] sm:$0x3f] }
  0x1d   : >> { %v3259_v51 = vld [vmem:[%s4436_s24 + $0x62] sm:$0xff]  ;;  %v385_v55 = vpack.c.bf16 %v380_v50, %v379_v49  ;;  %v381_v58 = vld [vmem:[%s4436_s24 + $0x30] sm:$0xff]  ;;  %v3291_v60 = vld [vmem:[%s4966_s1 + $0xe] sm:$0x3] }
  0x1e   : >> { %v883_v56 = vpack.c.bf16 %v3260_v52, %v3259_v51  ;;  %v3261_v62 = vld [vmem:[%s4436_s24 + $0x72] sm:$0xff]  ;;  %v3237_v63 = vld [vmem:[%s4966_s1 + $0x6] sm:$0x3]  ;;  %v3262_v5 = vld [vmem:[%s4436_s24 + $0x7a] sm:$0x3f]  ;;  %v386_v10 = vpack.c.bf16 %v382_v61, %v381_v58  ;;  %v1107_v26 = vsel %vm415_vm0, %v3291_v60, 0 }
  0x1f   : >> { %3716 = vmatmul.mubr.msk.bf16.gmra.mrb[4].mxu1 %vm402_vm1, %v399_v41  ;;  %v564_v6 = vld [vmem:[%s4436_s24 + $0x2] sm:$0xff]  ;;  %v565_v7 = vld [vmem:[%s4436_s24 + $0xa] sm:$0xff]  ;;  %v884_v11 = vpack.c.bf16 %v3262_v5, %v3261_v62  ;;  %v566_v14 = vld [vmem:[%s4436_s24 + $0x12] sm:$0xff]  ;;  %v696_v27 = vsel %vm415_vm0, %v3237_v63, 0 }
  0x20   : >> { %3756 = vmatmul.mubr.msk.bf16.gmra.mrb[4].mxu0 %vm402_vm1, %v782_v42  ;;  %3721 = vmatprep.mubr.msk.bf16.mxu1 %vm402_vm1, %v383_v43  ;;  %v3270_v8 = vld [vmem:[%s4436_s24 + $0x80] sm:$0xff]  ;;  %v3271_v9 = vld [vmem:[%s4436_s24 + $0x88] sm:$0xff]  ;;  %v572_v12 = vpack.c.bf16 %v565_v7, %v564_v6  ;;  %v3272_v16 = vld [vmem:[%s4436_s24 + $0x90] sm:$0xff] }
  0x21   : >> { %3761 = vmatprep.mubr.msk.bf16.mxu0 %vm402_vm1, %v881_v44  ;;  %v986_v13 = vpack.c.bf16 %v3271_v9, %v3270_v8  ;;  %v567_v15 = vld [vmem:[%s4436_s24 + $0x1a] sm:$0xff]  ;;  %v568_v18 = vld [vmem:[%s4436_s24 + $0x22] sm:$0xff]  ;;  %v569_v19 = vld [vmem:[%s4436_s24 + $0x2a] sm:$0xff] }
  0x22   : >> { %v3273_v17 = vld [vmem:[%s4436_s24 + $0x98] sm:$0xff]  ;;  %v3274_v20 = vld [vmem:[%s4436_s24 + $0xa0] sm:$0xff]  ;;  %v3275_v21 = vld [vmem:[%s4436_s24 + $0xa8] sm:$0xff]  ;;  %v573_v22 = vpack.c.bf16 %v567_v15, %v566_v14  ;;  %v574_v24 = vpack.c.bf16 %v569_v19, %v568_v18 }
  0x23   : >> { %v987_v23 = vpack.c.bf16 %v3273_v17, %v3272_v16  ;;  %v988_v25 = vpack.c.bf16 %v3275_v21, %v3274_v20  ;;  %v3304_v28 = vld [vmem:[%s4966_s1 + $0x10] sm:$0x3]  ;;  %v570_v29 = vld [vmem:[%s4436_s24 + $0x32] sm:$0xff]  ;;  %v571_v30 = vld [vmem:[%s4436_s24 + $0x3a] sm:$0x3f] }
  0x24   : >> { %v3276_v31 = vld [vmem:[%s4436_s24 + $0xb0] sm:$0xff]  ;;  %v3277_v32 = vld [vmem:[%s4436_s24 + $0xb8] sm:$0x3f]  ;;  %v3229_v33 = vld [vmem:[%s4436_s24 + $0x40] sm:$0xff]  ;;  %v575_v37 = vpack.c.bf16 %v571_v30, %v570_v29 }
  0x25   : >> { %v3230_v34 = vld [vmem:[%s4436_s24 + $0x48] sm:$0xff]  ;;  %v989_v38 = vpack.c.bf16 %v3277_v32, %v3276_v31  ;;  %v3231_v41 = vld [vmem:[%s4436_s24 + $0x50] sm:$0xff]  ;;  %v3232_v42 = vld [vmem:[%s4436_s24 + $0x58] sm:$0xff] }
  0x26   : >> { %v3283_v35 = vld [vmem:[%s4436_s24 + $0x81] sm:$0xff]  ;;  %v3284_v36 = vld [vmem:[%s4436_s24 + $0x89] sm:$0xff]  ;;  %v677_v39 = vpack.c.bf16 %v3230_v34, %v3229_v33  ;;  %v3285_v43 = vld [vmem:[%s4436_s24 + $0x91] sm:$0xff]  ;;  %v678_v49 = vpack.c.bf16 %v3232_v42, %v3231_v41 }
  0x27   : >> { %3722 = vmatmul.mubr.msk.bf16.vlgmr.msra.gmra.mrb[0].mxu1 %vm402_vm1, %v384_v53  ;;  %v1088_v40 = vpack.c.bf16 %v3284_v36, %v3283_v35  ;;  %v3286_v44 = vld [vmem:[%s4436_s24 + $0x99] sm:$0xff]  ;;  %v3234_v46 = vld [vmem:[%s4436_s24 + $0x68] sm:$0xff]  ;;  %v1209_v53 = vsel %vm415_vm0, %v3304_v28, 0  ;;  %vm4032_vm5 = vmpackc.low %vm1303_vm3, %vm4310_vm4 }
  0x28   : >> { %3762 = vmatmul.mubr.msk.bf16.vlgmr.msra.gmra.mrb[0].mxu0 %vm402_vm1, %v882_v54  ;;  %3725 = vmatprep.mubr.msk.bf16.mxu1 %vm402_vm1, %v385_v55  ;;  %v3233_v45 = vld [vmem:[%s4436_s24 + $0x60] sm:$0xff]  ;;  %v3288_v48 = vld [vmem:[%s4436_s24 + $0xa9] sm:$0xff]  ;;  %v1089_v50 = vpack.c.bf16 %v3286_v44, %v3285_v43  ;;  %v3236_v55 = vld [vmem:[%s4436_s24 + $0x78] sm:$0x3f] }
  0x29   : >> { %3770 = vmatpush3.bf16.msra.mxu0 %v1005_v57  ;;  %3765 = vmatprep.mubr.msk.bf16.mxu0 %vm402_vm1, %v883_v56  ;;  %v3287_v47 = vld [vmem:[%s4436_s24 + $0xa1] sm:$0xff]  ;;  %v679_v51 = vpack.c.bf16 %v3234_v46, %v3233_v45  ;;  %v3235_v54 = vld [vmem:[%s4436_s24 + $0x70] sm:$0xff]  ;;  %v3290_v57 = vld [vmem:[%s4436_s24 + $0xb9] sm:$0x3f] }
  0x2a   : >> { %3730 = vmatpush3.bf16.msra.mxu1 %v591_v59  ;;  %4184 = vmatprep.subr.msk.bf16.mxu0 %vm415_vm0, %v3291_v60  ;;  %v1090_v52 = vpack.c.bf16 %v3288_v48, %v3287_v47  ;;  %v3289_v56 = vld [vmem:[%s4436_s24 + $0xb1] sm:$0xff]  ;;  %v3296_v58 = vld [vmem:[%s4436_s24 + $0x82] sm:$0xff]  ;;  %v680_v60 = vpack.c.bf16 %v3236_v55, %v3235_v54  ;;  %v3299_v5 = vld [vmem:[%s4436_s24 + $0x9a] sm:$0xff] }
  0x2b   : >> { %4180 = vmatprep.subr.msk.bf16.mxu1 %vm415_vm0, %v3237_v63  ;;  %v3297_v59 = vld [vmem:[%s4436_s24 + $0x8a] sm:$0xff]  ;;  %v1091_v61 = vpack.c.bf16 %v3290_v57, %v3289_v56  ;;  %v3298_v63 = vld [vmem:[%s4436_s24 + $0x92] sm:$0xff]  ;;  %v3300_v6 = vld [vmem:[%s4436_s24 + $0xa2] sm:$0xff] }
  0x2c   : >> { %v1190_v62 = vpack.c.bf16 %v3297_v59, %v3296_v58  ;;  %v3301_v7 = vld [vmem:[%s4436_s24 + $0xaa] sm:$0xff]  ;;  %v1191_v8 = vpack.c.bf16 %v3299_v5, %v3298_v63  ;;  %v4607_v55 = vld [vmem:[%s4970_s5] ss:$0 sm:$0xff] (%p368_p4) }
  0x2d   : >> { %v1192_v9 = vpack.c.bf16 %v3301_v7, %v3300_v6  ;;  %v4602_v54 = vld [vmem:[%s4973_s8 + $0x8] sm:$0x7f] (%p368_p4) }
  0x2f   : >> { %3726 = vmatmul.mubr.msk.bf16.gmra.mrb[4].mxu1 %vm402_vm1, %v386_v10  ;;  %v3302_v10 = vld [vmem:[%s4436_s24 + $0xb2] sm:$0xff] }
  0x30   : >> { %3766 = vmatmul.mubr.msk.bf16.gmra.mrb[4].mxu0 %vm402_vm1, %v884_v11  ;;  %3731 = vmatprep.mubr.msk.bf16.mxu1 %vm402_vm1, %v572_v12  ;;  %v3303_v11 = vld [vmem:[%s4436_s24 + $0xba] sm:$0x3f] }
  0x31   : >> { %3771 = vmatprep.mubr.msk.bf16.mxu0 %vm402_vm1, %v986_v13  ;;  %v1193_v12 = vpack.c.bf16 %v3303_v11, %v3302_v10 }
  0x37   : >> { %3732 = vmatmul.mubr.msk.bf16.vlgmr.msra.gmra.mrb[0].mxu1 %vm402_vm1, %v573_v22 }
  0x38   : >> { %3772 = vmatmul.mubr.msk.bf16.vlgmr.msra.gmra.mrb[0].mxu0 %vm402_vm1, %v987_v23  ;;  %3735 = vmatprep.mubr.msk.bf16.mxu1 %vm402_vm1, %v574_v24 }
  0x39   : >> { %3780 = vmatpush3.bf16.msra.mxu0 %v1107_v26  ;;  %3775 = vmatprep.mubr.msk.bf16.mxu0 %vm402_vm1, %v988_v25 }
  0x3a   : >> { %3740 = vmatpush3.bf16.msra.mxu1 %v696_v27  ;;  %4185 = vmatprep.subr.msk.bf16.mxu0 %vm415_vm0, %v3304_v28 }
  0x3f   : >> { %3736 = vmatmul.mubr.msk.bf16.gmra.mrb[4].mxu1 %vm402_vm1, %v575_v37 }
  0x40   : >> { %3776 = vmatmul.mubr.msk.bf16.gmra.mrb[4].mxu0 %vm402_vm1, %v989_v38  ;;  %3741 = vmatprep.mubr.msk.bf16.mxu1 %vm402_vm1, %v677_v39 }
  0x41   : >> { %3781 = vmatprep.mubr.msk.bf16.mxu0 %vm402_vm1, %v1088_v40 }
  0x47   : >> { %3742 = vmatmul.mubr.msk.bf16.vlgmr.msra.gmra.mrb[0].mxu1 %vm402_vm1, %v678_v49 }
  0x48   : >> { %3782 = vmatmul.mubr.msk.bf16.vlgmr.msra.gmra.mrb[0].mxu0 %vm402_vm1, %v1089_v50  ;;  %3745 = vmatprep.mubr.msk.bf16.mxu1 %vm402_vm1, %v679_v51 }
  0x49   : >> { %3790 = vmatpush3.bf16.msra.mxu0 %v1209_v53  ;;  %3785 = vmatprep.mubr.msk.bf16.mxu0 %vm402_vm1, %v1090_v52  ;;  %v4597_v53 = vld [vmem:[%s4973_s8] sm:$0xff] (%p368_p4) }
  0x4f   : >> { %3746 = vmatmul.mubr.msk.bf16.gmra.mrb[4].mxu1 %vm402_vm1, %v680_v60 }
  0x50   : >> { %3786 = vmatmul.mubr.msk.bf16.gmra.mrb[4].mxu0 %vm402_vm1, %v1091_v61  ;;  %3815 = vmatprep.mubr.msk.f32.mxu1 %vm1290_vm2, %v4381_v0 }
  0x51   : >> { %3791 = vmatprep.mubr.msk.bf16.mxu0 %vm402_vm1, %v1190_v62 }
  0x58   : >> { %3792 = vmatmul.mubr.msk.bf16.vlgmr.msra.gmra.mrb[0].mxu0 %vm402_vm1, %v1191_v8 }
  0x59   : >> { %3795 = vmatprep.mubr.msk.bf16.mxu0 %vm402_vm1, %v1192_v9 }
  0x60   : >> { %3796 = vmatmul.mubr.msk.bf16.gmra.mrb[4].mxu0 %vm402_vm1, %v1193_v12 }
 0x11a   : >> { %v3743_v13 = vpop.f32.mrb[0].mxu1 }
 0x11b   : >> { %v732_v14 = vpop.f32.mrb[1].mxu1 }
 0x11c   : >> { %v3744_v15 = vpop.f32.mrb[2].mxu1 }
 0x11d   : >> { %v735_v16 = vpop.f32.mrb[3].mxu1 }
 0x122   : >> { %v3747_v17 = vpop.f32.mrb[4].mxu1 }
 0x123   : >> { %v748_v18 = vpop.f32.mrb[5].mxu1 }
 0x124   : >> { %v3748_v19 = vpop.f32.mrb[6].mxu1 }
 0x125   : >> { %v751_v20 = vpop.f32.mrb[7].mxu1 }
 0x12b   : >> { %v3793_v21 = vpop.f32.mrb[0].mxu0 }
 0x12c   : >> { %v4051_v22 = vadd.f32 %v3793_v21, %v3743_v13  ;;  %v1245_v23 = vpop.f32.mrb[1].mxu0 }
 0x12d   : >> { %v4052_v24 = vadd.f32 %v1245_v23, %v732_v14  ;;  %v3794_v25 = vpop.f32.mrb[2].mxu0 }
 0x12e   : >> { %v4053_v26 = vadd.f32 %v3794_v25, %v3744_v15  ;;  %v1248_v27 = vpop.f32.mrb[3].mxu0 }
 0x12f   : >> { %v4054_v28 = vadd.f32 %v1248_v27, %v735_v16 }
 0x130   : >> { %v4023_v29 = vpack.c.bf16 %v4053_v26, %v4051_v22 }
 0x131   : >> { %v4019_v30 = vpack.c.bf16 %v4054_v28, %v4052_v24 }
 0x133   : >> { %v3797_v31 = vpop.f32.mrb[4].mxu0  ;;  %4020 = vmatprep.subr.bf16.mxu1 %v4019_v30 }
 0x134   : >> { %v4055_v32 = vadd.f32 %v3797_v31, %v3747_v17  ;;  %v1261_v33 = vpop.f32.mrb[5].mxu0  ;;  %4022 = vmatpush3.bf16.msra.mxu1 %v4019_v30 }
 0x135   : >> { %v4056_v34 = vadd.f32 %v1261_v33, %v748_v18  ;;  %v3798_v35 = vpop.f32.mrb[6].mxu0  ;;  %4024 = vmatprep.subr.bf16.mxu1 %v4023_v29 }
 0x136   : >> { %v4057_v36 = vadd.f32 %v3798_v35, %v3748_v19  ;;  %v1264_v37 = vpop.f32.mrb[7].mxu0 }
 0x137   : >> { %v4058_v38 = vadd.f32 %v1264_v37, %v751_v20 }
 0x138   : >> { %v4031_v39 = vpack.c.bf16 %v4057_v36, %v4055_v32  ;;  %4026 = vmatpush3.bf16.msra.mxu1 %v4023_v29 }
 0x139   : >> { %v4027_v40 = vpack.c.bf16 %v4058_v38, %v4056_v34 }
 0x13b   : >> { %4028 = vmatprep.subr.bf16.mxu1 %v4027_v40 }
 0x13c   : >> { %4030 = vmatpush3.bf16.msra.mxu1 %v4027_v40 }
 0x13d   : >> { %4033 = vmatprep.subr.msk.bf16.mxu1 %vm4032_vm5, %v4031_v39 }
 0x140   : >> { %4036 = vmatpush3.bf16.msk.msra.mxu1 %vm4032_vm5, %v4031_v39 }
 0x143   : >> { %3816 = vmatmul.mubr.msk.f32.vlgmr.msra.gmra.mrb[8].mxu1 %vm1290_vm2, %v4386_v1 }
 0x144   : >> { %3818 = vmatprep.mubr.msk.f32.mxu1 %vm1290_vm2, %v4391_v2 }
 0x147   : >> { %3819 = vmatmul.mubr.msk.f32.gmra.mrb[10].mxu1 %vm1290_vm2, %v4396_v3 }
 0x216   : >> { %v3817_v41 = vpop.f32.mrb[8].mxu1 }
 0x217   : >> { %v1379_v42 = vadd.f32 %v3817_v41, %v4401_v4  ;;  %v1373_v43 = vpop.f32.mrb[9].mxu1 }
 0x218   : >> { %v1374_v44 = vadd.f32 %v4401_v4, %v1373_v43 }
 0x219   : >> { %v1393_v45 = vmax.f32 %v1379_v42, 0.0 }
 0x21a   : >> { %v1392_v46 = vmax.f32 %v1374_v44, 0.0  ;;  %v3820_v47 = vpop.f32.mrb[10].mxu1  ;;  %370 = sbr.rel (!%p368_p4) target bundleno = 17 (0x11), region = 147 }
 0x21b   : >> { %1400 = vst.msk [vmem:[%s1397_s20 + $0x8] sm:$0xff] %vm1398_vm6, %v1393_v45  ;;  %v1389_v48 = vadd.f32 %v3820_v47, %v4401_v4  ;;  %v1383_v49 = vpop.f32.mrb[11].mxu1 }
 0x21c   : >> { %1399 = vst.msk [vmem:[%s1397_s20] sm:$0xff] %vm1398_vm6, %v1392_v46  ;;  %v1384_v50 = vadd.f32 %v4401_v4, %v1383_v49 }
 0x21d   : >> { %v1395_v51 = vmax.f32 %v1389_v48, 0.0 }
 0x21e   : >> { %v1394_v52 = vmax.f32 %v1384_v50, 0.0 }
 0x21f   : >> { %1403 = vst.msk [vmem:[%s1397_s20 + $0x18] sm:$0x7f] %vm1402_vm7, %v1395_v51 }
 0x220   : >> { %1401 = vst.msk [vmem:[%s1397_s20 + $0x10] sm:$0xff] %vm1398_vm6, %v1394_v52 }
 0x221 LB: >> { %v4224_v0 = vld [vmem:[%s4967_s2 + $0x10] sm:$0xff]   ;;  %v4225_v1 = vld [vmem:[%s4967_s2 + $0x40] sm:$0xff]   ;;  %v4226_v2 = vld [vmem:[%s4967_s2 + $0x18] sm:$0xff]   ;;  %s3556_s14 = sshll.u32 %s4304_s27, 6  ;;  %vm2158_vm8 = vcmask 236544   ;;  %vm2165_vm9 = vcmask 1044480   ;;  %s4304_s27 = sphi %s4609_s27, %s1412_s27  }
 0x222   : >> { %3821 = vmatprep.subr.bf16.mxu1 %v4224_v0  ;;  %3853 = vmatprep.subr.bf16.mxu0 %v4225_v1  ;;  %v4227_v3 = vld [vmem:[%s4967_s2 + $0x48] sm:$0xff]   ;;  %s4627_s19 = scalar_lea.vmem [#allocation2], %s3556_s14  ;;  %v4228_v8 = vld [vmem:[%s4967_s2 + $0x50] sm:$0xff]   ;;  %v4229_v9 = vld [vmem:[%s4967_s2] sm:$0xff]   ;;  %vm4311_vm10 = vmmov 1   ;;  %vm2250_vm12 = vcmask 522240  }
 0x223   : >> { %3822 = vmatpush3.bf16.msra.mxu1 %v4224_v0  ;;  %3854 = vmatpush3.bf16.msra.mxu0 %v4225_v1  ;;  %v4230_v10 = vld [vmem:[%s4967_s2 + $0x58] sm:$0xff]   ;;  %v4231_v11 = vld [vmem:[%s4967_s2 + $0x8] sm:$0xff]   ;;  %v4232_v21 = vld [vmem:[%s4967_s2 + $0x60] sm:$0xff]   ;;  %vm2248_vm13 = vcmask 523264  }
 0x224   : >> { %3823 = vmatprep.subr.bf16.mxu1 %v4226_v2  ;;  %3855 = vmatprep.subr.bf16.mxu0 %v4227_v3  ;;  %v4233_v22 = vld [vmem:[%s4967_s2 + $0x20] sm:$0xff]   ;;  %v4235_v30 = vld [vmem:[%s4967_s2 + $0x28] sm:$0xff]   ;;  %v4237_v34 = vld [vmem:[%s4967_s2 + $0x30] sm:$0xff]  }
 0x225   : >> { %v4234_v31 = vld [vmem:[%s4967_s2 + $0x68] sm:$0xff]   ;;  %v4236_v35 = vld [vmem:[%s4967_s2 + $0x70] sm:$0xff]   ;;  %v4239_v46 = vld [vmem:[%s4967_s2 + $0x38] sm:$0xff]  }
 0x226   : >> { %v4238_v47 = vld [vmem:[%s4967_s2 + $0x78] sm:$0xff]   ;;  %v4240_v50 = vld [vmem:[%s4967_s2 + $0x80] sm:$0xff]   ;;  %vm4727_vm11 = vmpackc.low %vm2165_vm9, %vm4311_vm10 }
 0x227   : >> { %v1426_v4 = vld [vmem:[%s4627_s19 + $0x1] sm:$0xff]  ;;  %v1427_v56 = vld [vmem:[%s4627_s19 + $0x9] sm:$0xff]  ;;  %v1428_v60 = vld [vmem:[%s4627_s19 + $0x11] sm:$0xff]  ;;  %3824 = vmatpush3.bf16.msra.mxu1 %v4226_v2  ;;  %3856 = vmatpush3.bf16.msra.mxu0 %v4227_v3 }
 0x228   : >> { %v3352_v57 = vld [vmem:[%s4627_s19 + $0x21] sm:$0xff]  ;;  %v1430_v58 = vpack.c.bf16 %v1427_v56, %v1426_v4  ;;  %v3353_v59 = vld [vmem:[%s4627_s19 + $0x29] sm:$0xff]  ;;  %v1429_v61 = vld [vmem:[%s4627_s19 + $0x19] sm:$0x1f]  ;;  %3861 = vmatprep.subr.bf16.mxu0 %v4228_v8  ;;  %3829 = vmatprep.subr.bf16.mxu1 %v4229_v9 }
 0x229   : >> { %v1743_v62 = vpack.c.bf16 %v3353_v59, %v3352_v57  ;;  %v1431_v63 = vpack.c.bf16 %v1429_v61, %v1428_v60  ;;  %v3354_v5 = vld [vmem:[%s4627_s19 + $0x31] sm:$0xff]  ;;  %v3355_v6 = vld [vmem:[%s4627_s19 + $0x39] sm:$0x1f]  ;;  %v1416_v12 = vld [vmem:[%s4627_s19] sm:$0xff] }
 0x22a   : >> { %3825 = vmatprep.mubr.msk.bf16.mxu1 %vm1398_vm6, %v1430_v58  ;;  %v1744_v7 = vpack.c.bf16 %v3355_v6, %v3354_v5  ;;  %v1417_v13 = vld [vmem:[%s4627_s19 + $0x8] sm:$0xff]  ;;  %v1418_v18 = vld [vmem:[%s4627_s19 + $0x10] sm:$0xff]  ;;  %v1419_v19 = vld [vmem:[%s4627_s19 + $0x18] sm:$0x1f] }
 0x22b   : >> { %3857 = vmatprep.mubr.msk.bf16.mxu0 %vm1398_vm6, %v1743_v62  ;;  %3826 = vmatmul.mubr.msk.bf16.vlgmr.msra.gmra.mrb[0].mxu1 %vm1398_vm6, %v1431_v63  ;;  %v3364_v14 = vld [vmem:[%s4627_s19 + $0x22] sm:$0xff]  ;;  %v3365_v15 = vld [vmem:[%s4627_s19 + $0x2a] sm:$0xff]  ;;  %v1420_v16 = vpack.c.bf16 %v1417_v13, %v1416_v12  ;;  %v3366_v20 = vld [vmem:[%s4627_s19 + $0x32] sm:$0xff]  ;;  %v1421_v24 = vpack.c.bf16 %v1419_v19, %v1418_v18 }
 0x22c   : >> { %3858 = vmatmul.mubr.msk.bf16.vlgmr.msra.gmra.mrb[0].mxu0 %vm1398_vm6, %v1744_v7  ;;  %3830 = vmatpush3.bf16.msra.mxu1 %v4229_v9  ;;  %v1825_v17 = vpack.c.bf16 %v3365_v15, %v3364_v14  ;;  %v3367_v23 = vld [vmem:[%s4627_s19 + $0x3a] sm:$0x1f]  ;;  %v1572_v25 = vld [vmem:[%s4627_s19 + $0x2] sm:$0xff]  ;;  %v1573_v26 = vld [vmem:[%s4627_s19 + $0xa] sm:$0xff] }
 0x22d   : >> { %3862 = vmatpush3.bf16.msra.mxu0 %v4228_v8  ;;  %3831 = vmatprep.subr.bf16.mxu1 %v4231_v11  ;;  %v1826_v27 = vpack.c.bf16 %v3367_v23, %v3366_v20  ;;  %v3378_v28 = vld [vmem:[%s4627_s19 + $0x40] sm:$0xff]  ;;  %v3379_v29 = vld [vmem:[%s4627_s19 + $0x48] sm:$0xff]  ;;  %v1576_v32 = vpack.c.bf16 %v1573_v26, %v1572_v25  ;;  %v1574_v36 = vld [vmem:[%s4627_s19 + $0x12] sm:$0xff] }
 0x22e   : >> { %3863 = vmatprep.subr.bf16.mxu0 %v4230_v10  ;;  %3833 = vmatprep.mubr.msk.bf16.mxu1 %vm1398_vm6, %v1420_v16  ;;  %v1910_v33 = vpack.c.bf16 %v3379_v29, %v3378_v28  ;;  %v1575_v37 = vld [vmem:[%s4627_s19 + $0x1a] sm:$0x1f]  ;;  %v3380_v38 = vld [vmem:[%s4627_s19 + $0x50] sm:$0xff]  ;;  %v3340_v41 = vld [vmem:[%s4627_s19 + $0x20] sm:$0xff] }
 0x22f   : >> { %3865 = vmatprep.mubr.msk.bf16.mxu0 %vm1398_vm6, %v1825_v17  ;;  %v3381_v39 = vld [vmem:[%s4627_s19 + $0x58] sm:$0x1f]  ;;  %v1577_v40 = vpack.c.bf16 %v1575_v37, %v1574_v36  ;;  %v3341_v42 = vld [vmem:[%s4627_s19 + $0x28] sm:$0xff]  ;;  %v3342_v51 = vld [vmem:[%s4627_s19 + $0x30] sm:$0xff] }
 0x230   : >> { %3832 = vmatpush3.bf16.msra.mxu1 %v4231_v11  ;;  %v1911_v43 = vpack.c.bf16 %v3381_v39, %v3380_v38  ;;  %v3390_v44 = vld [vmem:[%s4627_s19 + $0x41] sm:$0xff]  ;;  %v3391_v45 = vld [vmem:[%s4627_s19 + $0x49] sm:$0xff]  ;;  %v1661_v48 = vpack.c.bf16 %v3341_v42, %v3340_v41  ;;  %v3343_v52 = vld [vmem:[%s4627_s19 + $0x38] sm:$0x1f] }
 0x231   : >> { %3864 = vmatpush3.bf16.msra.mxu0 %v4230_v10  ;;  %3837 = vmatprep.subr.bf16.mxu1 %v4233_v22  ;;  %v1992_v49 = vpack.c.bf16 %v3391_v45, %v3390_v44  ;;  %v3392_v0 = vld [vmem:[%s4627_s19 + $0x51] sm:$0xff]  ;;  %v3393_v1 = vld [vmem:[%s4627_s19 + $0x59] sm:$0x1f]  ;;  %v3402_v2 = vld [vmem:[%s4627_s19 + $0x42] sm:$0xff]  ;;  %v1662_v4 = vpack.c.bf16 %v3343_v52, %v3342_v51 }
 0x232   : >> { %3869 = vmatprep.subr.bf16.mxu0 %v4232_v21  ;;  %v3403_v3 = vld [vmem:[%s4627_s19 + $0x4a] sm:$0xff]  ;;  %v1993_v56 = vpack.c.bf16 %v3393_v1, %v3392_v0  ;;  %v3404_v59 = vld [vmem:[%s4627_s19 + $0x52] sm:$0xff]  ;;  %v3405_v60 = vld [vmem:[%s4627_s19 + $0x5a] sm:$0x1f]  ;;  %s3418_s19 = sshll.u32 %s4304_s27, 4  ;;  %s1412_s27 = sadd.s32 1, %s4304_s27  }
 0x233   : >> { %v2074_v57 = vpack.c.bf16 %v3403_v3, %v3402_v2  ;;  %v4241_v58 = vld [vmem:[%s4967_s2 + $0x88] sm:$0xff]   ;;  %v2075_v61 = vpack.c.bf16 %v3405_v60, %v3404_v59  ;;  %s2247_s16 = scalar_lea.vmem [#allocation3], %s3418_s19  ;;  %p1409_p5 = scmp.ge.s32.totalorder %s1412_s27, 15  }
 0x234   : > { %v4752_v25 = vld [vmem:[%s4971_s6] ss:$0 sm:$0xff] (%p1409_p5)  ;;  %s4754_s21 = smov (%p1409_p5), 0  }
 0x237   : >> { %3834 = vmatmul.mubr.msk.bf16.vlgmr.msra.gmra.mrb[0].mxu1 %vm1398_vm6, %v1421_v24  ;;  %v4747_v24 = vld [vmem:[%s4974_s9] sm:$0x7f] (%p1409_p5) }
 0x238   : >> { %3866 = vmatmul.mubr.msk.bf16.vlgmr.msra.gmra.mrb[0].mxu0 %vm1398_vm6, %v1826_v27  ;;  %3838 = vmatpush3.bf16.msra.mxu1 %v4233_v22 }
 0x239   : >> { %3870 = vmatpush3.bf16.msra.mxu0 %v4232_v21  ;;  %3839 = vmatprep.subr.bf16.mxu1 %v4235_v30 }
 0x23a   : >> { %3871 = vmatprep.subr.bf16.mxu0 %v4234_v31  ;;  %3841 = vmatprep.mubr.msk.bf16.mxu1 %vm1398_vm6, %v1576_v32 }
 0x23b   : >> { %3873 = vmatprep.mubr.msk.bf16.mxu0 %vm1398_vm6, %v1910_v33 }
 0x23c   : >> { %3840 = vmatpush3.bf16.msra.mxu1 %v4235_v30 }
 0x23d   : >> { %3872 = vmatpush3.bf16.msra.mxu0 %v4234_v31  ;;  %3845 = vmatprep.subr.bf16.mxu1 %v4237_v34 }
 0x23e   : >> { %3877 = vmatprep.subr.bf16.mxu0 %v4236_v35 }
 0x243   : >> { %3842 = vmatmul.mubr.msk.bf16.vlgmr.msra.gmra.mrb[0].mxu1 %vm1398_vm6, %v1577_v40 }
 0x244   : >> { %3874 = vmatmul.mubr.msk.bf16.vlgmr.msra.gmra.mrb[0].mxu0 %vm1398_vm6, %v1911_v43  ;;  %3846 = vmatpush3.bf16.msra.mxu1 %v4237_v34 }
 0x245   : >> { %3878 = vmatpush3.bf16.msra.mxu0 %v4236_v35  ;;  %3847 = vmatprep.subr.bf16.mxu1 %v4239_v46 }
 0x246   : >> { %3879 = vmatprep.subr.bf16.mxu0 %v4238_v47  ;;  %3849 = vmatprep.mubr.msk.bf16.mxu1 %vm1398_vm6, %v1661_v48 }
 0x247   : >> { %3881 = vmatprep.mubr.msk.bf16.mxu0 %vm1398_vm6, %v1992_v49 }
 0x248   : >> { %3848 = vmatpush3.bf16.msra.mxu1 %v4239_v46 }
 0x249   : >> { %3880 = vmatpush3.bf16.msra.mxu0 %v4238_v47 }
 0x24a   : >> { %3885 = vmatprep.subr.bf16.mxu0 %v4240_v50 }
 0x24f   : >> { %3850 = vmatmul.mubr.msk.bf16.vlgmr.msra.gmra.mrb[0].mxu1 %vm1398_vm6, %v1662_v4 }
 0x250   : >> { %3882 = vmatmul.mubr.msk.bf16.vlgmr.msra.gmra.mrb[0].mxu0 %vm1398_vm6, %v1993_v56  ;;  %3901 = vmatprep.mubr.msk.f32.mxu1 %vm2158_vm8, %v4597_v53 }
 0x251   : >> { %3886 = vmatpush3.bf16.msra.mxu0 %v4240_v50  ;;  %3889 = vmatprep.mubr.msk.bf16.mxu0 %vm1398_vm6, %v2074_v57 }
 0x252   : >> { %3887 = vmatprep.subr.bf16.mxu0 %v4241_v58 }
 0x255   : >> { %3888 = vmatpush3.bf16.msra.mxu0 %v4241_v58 }
 0x25c   : >> { %3890 = vmatmul.mubr.msk.bf16.vlgmr.msra.gmra.mrb[0].mxu0 %vm1398_vm6, %v2075_v61 }
 0x322   : >> { %v3851_v62 = vpop.f32.mrb[0].mxu1 }
 0x323   : >> { %v1720_v63 = vpop.f32.mrb[1].mxu1 }
 0x324   : >> { %v3852_v5 = vpop.f32.mrb[2].mxu1 }
 0x325   : >> { %v1723_v6 = vpop.f32.mrb[3].mxu1 }
 0x32f   : >> { %v3891_v7 = vpop.f32.mrb[0].mxu0 }
 0x330   : >> { %v4115_v8 = vadd.f32 %v3891_v7, %v3851_v62  ;;  %v2133_v9 = vpop.f32.mrb[1].mxu0 }
 0x331   : >> { %v4116_v10 = vadd.f32 %v2133_v9, %v1720_v63  ;;  %v3892_v11 = vpop.f32.mrb[2].mxu0 }
 0x332   : >> { %v4117_v12 = vadd.f32 %v3892_v11, %v3852_v5  ;;  %v2136_v13 = vpop.f32.mrb[3].mxu0 }
 0x333   : >> { %v4118_v14 = vadd.f32 %v2136_v13, %v1723_v6 }
 0x334   : >> { %v4041_v15 = vpack.c.bf16 %v4117_v12, %v4115_v8 }
 0x335   : >> { %v4037_v16 = vpack.c.bf16 %v4118_v14, %v4116_v10 }
 0x337   : >> { %4038 = vmatprep.subr.bf16.mxu1 %v4037_v16 }
 0x338   : >> { %4040 = vmatpush3.bf16.msra.mxu1 %v4037_v16 }
 0x339   : >> { %4043 = vmatprep.subr.msk.bf16.mxu1 %vm4727_vm11, %v4041_v15 }
 0x33c   : >> { %4046 = vmatpush3.bf16.msk.msra.mxu1 %vm4727_vm11, %v4041_v15 }
 0x33f   : >> { %3902 = vmatmul.mubr.msk.f32.vlgmr.msra.gmra.mrb[4].mxu1 %vm2158_vm8, %v4602_v54 }
 0x412   : >> { %v3903_v18 = vpop.f32.mrb[4].mxu1  ;;  %1411 = sbr.rel (!%p1409_p5) target bundleno = 545 (0x221), region = 158 }
 0x413   : >> { %v2241_v19 = vadd.f32 %v3903_v18, %v4607_v55  ;;  %v2235_v20 = vpop.f32.mrb[5].mxu1 }
 0x414   : >> { %v2236_v21 = vadd.f32 %v4607_v55, %v2235_v20 }
 0x415   : >> { %v2245_v22 = vmax.f32 %v2241_v19, 0.0 }
 0x416   : >> { %v2244_v23 = vmax.f32 %v2236_v21, 0.0 }
 0x417   : >> { %2251 = vst.msk [vmem:[%s2247_s16 + $0x8] sm:$0x7f] %vm2250_vm12, %v2245_v22 }
 0x418   : >> { %2249 = vst.msk [vmem:[%s2247_s16] sm:$0xff] %vm2248_vm13, %v2244_v23 }
 0x419 LB: >> { %v4242_v53 = vld [vmem:[%s4968_s3 + $0x20] sm:$0xff]   ;;  %v4312_v54 = vmov 0.0   ;;  %v4244_v26 = vld [vmem:[%s4968_s3 + $0x28] sm:$0xff]   ;;  %vm4313_vm14 = vmmov 0   ;;  %s3559_s28 = sshll.u32 %s4308_s21, 5  ;;  %v4246_v28 = vld [vmem:[%s4968_s3 + $0x30] sm:$0xff]   ;;  %s4308_s21 = sphi %s4754_s21, %s2259_s21  }
 0x41a   : >> { %3904 = vmatprep.subr.bf16.mxu1 %v4312_v54  ;;  %3952 = vmatprep.subr.bf16.mxu0 %v4312_v54  ;;  %v4243_v55 = vld [vmem:[%s4968_s3 + $0x80] sm:$0xff]   ;;  %v4245_v27 = vld [vmem:[%s4968_s3 + $0x88] sm:$0xff]   ;;  %v4247_v29 = vld [vmem:[%s4968_s3 + $0x90] sm:$0xff]   ;;  %s4794_s22 = scalar_lea.vmem [#allocation3], %s3559_s28  ;;  %vm3009_vm15 = vcmask 105472   ;;  %vm3091_vm0 = vcmask 519168  }
 0x41b   : >> { %3905 = vmatpush3.bf16.msra.mxu1 %v4242_v53  ;;  %3912 = vmatprep.mubr.msk.bf16.mxu1 %vm4313_vm14, %v4312_v54  ;;  %v4248_v30 = vld [vmem:[%s4968_s3 + $0x38] sm:$0xff]   ;;  %v4250_v37 = vld [vmem:[%s4968_s3] sm:$0xff]   ;;  %v4252_v40 = vld [vmem:[%s4968_s3 + $0x8] sm:$0xff]   ;;  %vm3092_vm1 = vsmask.f32 3328 }
 0x41c   : >> { %3953 = vmatpush3.bf16.msra.mxu0 %v4243_v55  ;;  %3906 = vmatprep.subr.bf16.mxu1 %v4312_v54  ;;  %v4249_v31 = vld [vmem:[%s4968_s3 + $0x98] sm:$0xff]   ;;  %v4251_v39 = vld [vmem:[%s4968_s3 + $0xa0] sm:$0xff]   ;;  %v4253_v41 = vld [vmem:[%s4968_s3 + $0xa8] sm:$0xff]  }
 0x41d   : >> { %3954 = vmatprep.subr.bf16.mxu0 %v4312_v54  ;;  %3960 = vmatprep.mubr.msk.bf16.mxu0 %vm4313_vm14, %v4312_v54  ;;  %v4254_v42 = vld [vmem:[%s4968_s3 + $0x10] sm:$0xff]   ;;  %v4256_v44 = vld [vmem:[%s4968_s3 + $0x18] sm:$0xff]   ;;  %v4258_v51 = vld [vmem:[%s4968_s3 + $0x40] sm:$0xff]  }
 0x41e   : >> { %v4255_v43 = vld [vmem:[%s4968_s3 + $0xb0] sm:$0xff]   ;;  %v4257_v45 = vld [vmem:[%s4968_s3 + $0xb8] sm:$0xff]   ;;  %v4259_v0 = vld [vmem:[%s4968_s3 + $0xc0] sm:$0xff]  }
 0x41f   : >> { %3907 = vmatpush3.bf16.msra.mxu1 %v4244_v26  ;;  %v2274_v32 = vld [vmem:[%s4794_s22 + $0x1] sm:$0xff]  ;;  %v2275_v33 = vld [vmem:[%s4794_s22 + $0x9] sm:$0x1f]  ;;  %v3469_v34 = vld [vmem:[%s4794_s22 + $0x11] sm:$0xff] }
 0x420   : >> { %3955 = vmatpush3.bf16.msra.mxu0 %v4245_v27  ;;  %3908 = vmatprep.subr.bf16.mxu1 %v4312_v54  ;;  %v3470_v35 = vld [vmem:[%s4794_s22 + $0x19] sm:$0x1f]  ;;  %v2276_v36 = vpack.c.bf16 %v2275_v33, %v2274_v32  ;;  %v2263_v46 = vld [vmem:[%s4794_s22] sm:$0xff]  ;;  %v2264_v47 = vld [vmem:[%s4794_s22 + $0x8] sm:$0x1f]  ;;  %v4314_v27 = vmov 0.0|0.0  }
 0x421   : >> { %3956 = vmatprep.subr.bf16.mxu0 %v4312_v54  ;;  %v2592_v38 = vpack.c.bf16 %v3470_v35, %v3469_v34  ;;  %v3484_v48 = vld [vmem:[%s4794_s22 + $0x12] sm:$0xff]  ;;  %v3485_v49 = vld [vmem:[%s4794_s22 + $0x1a] sm:$0x1f]  ;;  %v2265_v50 = vpack.c.bf16 %v2264_v47, %v2263_v46  ;;  %v4260_v1 = vld [vmem:[%s4968_s3 + $0x48] sm:$0xff]  }
 0x422   : >> { %v2674_v52 = vpack.c.bf16 %v3485_v49, %v3484_v48  ;;  %v4261_v2 = vld [vmem:[%s4968_s3 + $0xc8] sm:$0xff]   ;;  %v4262_v3 = vld [vmem:[%s4968_s3 + $0x50] sm:$0xff]   ;;  %v4264_v56 = vld [vmem:[%s4968_s3 + $0x58] sm:$0xff]  }
 0x423   : >> { %3909 = vmatpush3.bf16.msra.mxu1 %v4246_v28  ;;  %v4263_v4 = vld [vmem:[%s4968_s3 + $0xd0] sm:$0xff]   ;;  %v2423_v57 = vld [vmem:[%s4794_s22 + $0x2] sm:$0xff]  ;;  %v2424_v58 = vld [vmem:[%s4794_s22 + $0xa] sm:$0x1f] }
 0x424   : >> { %3957 = vmatpush3.bf16.msra.mxu0 %v4247_v29  ;;  %3910 = vmatprep.subr.bf16.mxu1 %v4312_v54  ;;  %v4265_v59 = vld [vmem:[%s4968_s3 + $0xd8] sm:$0xff]   ;;  %v3501_v60 = vld [vmem:[%s4794_s22 + $0x20] sm:$0xff]  ;;  %v3502_v61 = vld [vmem:[%s4794_s22 + $0x28] sm:$0x1f]  ;;  %v2425_v62 = vpack.c.bf16 %v2424_v58, %v2423_v57 }
 0x425   : >> { %3958 = vmatprep.subr.bf16.mxu0 %v4312_v54  ;;  %v4266_v63 = vld [vmem:[%s4968_s3 + $0x60] sm:$0xff]   ;;  %v2759_v5 = vpack.c.bf16 %v3502_v61, %v3501_v60  ;;  %v4268_v7 = vld [vmem:[%s4968_s3 + $0x68] sm:$0xff]   ;;  %v4270_v9 = vld [vmem:[%s4968_s3 + $0x70] sm:$0xff]  }
 0x426   : >> { %v4267_v6 = vld [vmem:[%s4968_s3 + $0xe0] sm:$0xff]   ;;  %v4269_v8 = vld [vmem:[%s4968_s3 + $0xe8] sm:$0xff]   ;;  %v4271_v10 = vld [vmem:[%s4968_s3 + $0xf0] sm:$0xff]  }
 0x427   : >> { %3911 = vmatpush3.bf16.msra.mxu1 %v4248_v30  ;;  %v4272_v11 = vld [vmem:[%s4968_s3 + $0x78] sm:$0xff]   ;;  %v3454_v12 = vld [vmem:[%s4794_s22 + $0x10] sm:$0xff]  ;;  %v3516_v15 = vld [vmem:[%s4794_s22 + $0x21] sm:$0xff] }
 0x428   : >> { %3959 = vmatpush3.bf16.msra.mxu0 %v4249_v31  ;;  %3916 = vmatprep.subr.bf16.mxu1 %v4312_v54  ;;  %v3455_v13 = vld [vmem:[%s4794_s22 + $0x18] sm:$0x1f]  ;;  %v3517_v16 = vld [vmem:[%s4794_s22 + $0x29] sm:$0x1f]  ;;  %v4274_v20 = vld [vmem:[%s4968_s3 + $0x100] sm:$0xff]  }
 0x429   : >> { %3964 = vmatprep.subr.bf16.mxu0 %v4312_v54  ;;  %v4273_v14 = vld [vmem:[%s4968_s3 + $0xf8] sm:$0xff]   ;;  %v2510_v18 = vpack.c.bf16 %v3455_v13, %v3454_v12  ;;  %v2841_v19 = vpack.c.bf16 %v3517_v16, %v3516_v15  ;;  %v4275_v21 = vld [vmem:[%s4968_s3 + $0x108] sm:$0xff]   ;;  %v4276_v22 = vld [vmem:[%s4968_s3 + $0x110] sm:$0xff]  }
 0x42a   : >> { %3913 = vmatmul.mubr.msk.bf16.vlgmr.msra.gmra.mrb[0].mxu1 %vm2248_vm13, %v2276_v36  ;;  %v4277_v23 = vld [vmem:[%s4968_s3 + $0x118] sm:$0xff]   ;;  %v3531_v53 = vld [vmem:[%s4794_s22 + $0x22] sm:$0xff]  ;;  %v3532_v55 = vld [vmem:[%s4794_s22 + $0x2a] sm:$0x1f]  ;;  %s3549_s22 = sshll.u32 %s4308_s21, 2  ;;  %s2259_s21 = sadd.s32 1, %s4308_s21  }
 0x42b   : >> { %3917 = vmatpush3.bf16.msra.mxu1 %v4250_v37  ;;  %3961 = vmatmul.mubr.msk.bf16.vlgmr.msra.gmra.mrb[0].mxu0 %vm2248_vm13, %v2592_v38  ;;  %v2923_v26 = vpack.c.bf16 %v3532_v55, %v3531_v53  ;;  %s3090_s30 = scalar_lea.vmem %s4411_s12, %s3549_s22  ;;  %vm3093_vm2 = vmand %vm3091_vm0, %vm3092_vm1  ;;  %p2256_p6 = scmp.ge.s32.totalorder %s2259_s21, 7  }
 0x42c   : >> { %3965 = vmatpush3.bf16.msra.mxu0 %v4251_v39  ;;  %3918 = vmatprep.subr.bf16.mxu1 %v4312_v54 }
 0x42d   : >> { %3966 = vmatprep.subr.bf16.mxu0 %v4312_v54  ;;  %3924 = vmatprep.mubr.msk.bf16.mxu1 %vm4313_vm14, %v4312_v54 }
 0x42e   : >> { %3972 = vmatprep.mubr.msk.bf16.mxu0 %vm4313_vm14, %v4312_v54 }
 0x42f   : >> { %3919 = vmatpush3.bf16.msra.mxu1 %v4252_v40 }
 0x430   : >> { %3967 = vmatpush3.bf16.msra.mxu0 %v4253_v41  ;;  %3920 = vmatprep.subr.bf16.mxu1 %v4312_v54 }
 0x431   : >> { %3968 = vmatprep.subr.bf16.mxu0 %v4312_v54 }
 0x433   : >> { %3921 = vmatpush3.bf16.msra.mxu1 %v4254_v42  ;;  %v3094_v42 = vld [vmem:[%s3090_s30] sm:$0xf] }
 0x434   : >> { %3969 = vmatpush3.bf16.msra.mxu0 %v4255_v43  ;;  %3922 = vmatprep.subr.bf16.mxu1 %v4312_v54 }
 0x435   : >> { %3970 = vmatprep.subr.bf16.mxu0 %v4312_v54 }
 0x437   : >> { %3923 = vmatpush3.bf16.msra.mxu1 %v4256_v44 }
 0x438   : >> { %3971 = vmatpush3.bf16.msra.mxu0 %v4257_v45  ;;  %3928 = vmatprep.subr.bf16.mxu1 %v4312_v54 }
 0x439   : >> { %3976 = vmatprep.subr.bf16.mxu0 %v4312_v54 }
 0x43a   : >> { %3925 = vmatmul.mubr.msk.bf16.vlgmr.msra.gmra.mrb[0].mxu1 %vm2248_vm13, %v2265_v50 }
 0x43b   : >> { %3929 = vmatpush3.bf16.msra.mxu1 %v4258_v51  ;;  %3973 = vmatmul.mubr.msk.bf16.vlgmr.msra.gmra.mrb[0].mxu0 %vm2248_vm13, %v2674_v52 }
 0x43c   : >> { %3977 = vmatpush3.bf16.msra.mxu0 %v4259_v0  ;;  %3930 = vmatprep.subr.bf16.mxu1 %v4312_v54 }
 0x43d   : >> { %3978 = vmatprep.subr.bf16.mxu0 %v4312_v54  ;;  %3936 = vmatprep.mubr.msk.bf16.mxu1 %vm4313_vm14, %v4312_v54 }
 0x43e   : >> { %3984 = vmatprep.mubr.msk.bf16.mxu0 %vm4313_vm14, %v4312_v54 }
 0x43f   : >> { %3931 = vmatpush3.bf16.msra.mxu1 %v4260_v1 }
 0x440   : >> { %3979 = vmatpush3.bf16.msra.mxu0 %v4261_v2  ;;  %3932 = vmatprep.subr.bf16.mxu1 %v4312_v54 }
 0x441   : >> { %3980 = vmatprep.subr.bf16.mxu0 %v4312_v54 }
 0x443   : >> { %3933 = vmatpush3.bf16.msra.mxu1 %v4262_v3 }
 0x444   : >> { %3981 = vmatpush3.bf16.msra.mxu0 %v4263_v4  ;;  %3934 = vmatprep.subr.bf16.mxu1 %v4312_v54 }
 0x445   : >> { %3982 = vmatprep.subr.bf16.mxu0 %v4312_v54 }
 0x447   : >> { %3935 = vmatpush3.bf16.msra.mxu1 %v4264_v56 }
 0x448   : >> { %3983 = vmatpush3.bf16.msra.mxu0 %v4265_v59  ;;  %3940 = vmatprep.subr.bf16.mxu1 %v4312_v54 }
 0x449   : >> { %3988 = vmatprep.subr.bf16.mxu0 %v4312_v54 }
 0x44a   : >> { %3937 = vmatmul.mubr.msk.bf16.vlgmr.msra.gmra.mrb[0].mxu1 %vm2248_vm13, %v2425_v62 }
 0x44b   : >> { %3941 = vmatpush3.bf16.msra.mxu1 %v4266_v63  ;;  %3985 = vmatmul.mubr.msk.bf16.vlgmr.msra.gmra.mrb[0].mxu0 %vm2248_vm13, %v2759_v5 }
 0x44c   : >> { %3989 = vmatpush3.bf16.msra.mxu0 %v4267_v6  ;;  %3942 = vmatprep.subr.bf16.mxu1 %v4312_v54 }
 0x44d   : >> { %3990 = vmatprep.subr.bf16.mxu0 %v4312_v54  ;;  %3948 = vmatprep.mubr.msk.bf16.mxu1 %vm4313_vm14, %v4312_v54 }
 0x44e   : >> { %3996 = vmatprep.mubr.msk.bf16.mxu0 %vm4313_vm14, %v4312_v54 }
 0x44f   : >> { %3943 = vmatpush3.bf16.msra.mxu1 %v4268_v7 }
 0x450   : >> { %3991 = vmatpush3.bf16.msra.mxu0 %v4269_v8  ;;  %3944 = vmatprep.subr.bf16.mxu1 %v4312_v54 }
 0x451   : >> { %3992 = vmatprep.subr.bf16.mxu0 %v4312_v54 }
 0x453   : >> { %3945 = vmatpush3.bf16.msra.mxu1 %v4270_v9 }
 0x454   : >> { %3993 = vmatpush3.bf16.msra.mxu0 %v4271_v10  ;;  %3946 = vmatprep.subr.bf16.mxu1 %v4312_v54 }
 0x455   : >> { %3994 = vmatprep.subr.bf16.mxu0 %v4312_v54 }
 0x457   : >> { %3947 = vmatpush3.bf16.msra.mxu1 %v4272_v11 }
 0x458   : >> { %3995 = vmatpush3.bf16.msra.mxu0 %v4273_v14  ;;  %4047 = vmatprep.subr.bf16.mxu1 %v4314_v27 }
 0x459   : >> { %4000 = vmatprep.subr.bf16.mxu0 %v4312_v54 }
 0x45a   : >> { %3949 = vmatmul.mubr.msk.bf16.vlgmr.msra.gmra.mrb[0].mxu1 %vm2248_vm13, %v2510_v18 }
 0x45b   : >> { %3997 = vmatmul.mubr.msk.bf16.vlgmr.msra.gmra.mrb[0].mxu0 %vm2248_vm13, %v2841_v19  ;;  %4016 = vmatprep.mubr.msk.f32.mxu1 %vm4313_vm14, %v4312_v54 }
 0x45c   : >> { %4001 = vmatpush3.bf16.msra.mxu0 %v4274_v20  ;;  %4008 = vmatprep.mubr.msk.bf16.mxu0 %vm4313_vm14, %v4312_v54 }
 0x45d   : >> { %4002 = vmatprep.subr.bf16.mxu0 %v4312_v54 }
 0x460   : >> { %4003 = vmatpush3.bf16.msra.mxu0 %v4275_v21 }
 0x461   : >> { %4004 = vmatprep.subr.bf16.mxu0 %v4312_v54 }
 0x464   : >> { %4005 = vmatpush3.bf16.msra.mxu0 %v4276_v22 }
 0x465   : >> { %4006 = vmatprep.subr.bf16.mxu0 %v4312_v54 }
 0x468   : >> { %4007 = vmatpush3.bf16.msra.mxu0 %v4277_v23 }
 0x46b   : >> { %4009 = vmatmul.mubr.msk.bf16.vlgmr.msra.gmra.mrb[0].mxu0 %vm2248_vm13, %v2923_v26 }
 0x52d   : >> { %v2581_v28 = vpop.f32.mrb[0].mxu1 }
 0x52e   : >> { %v3950_v29 = vpop.f32.mrb[1].mxu1 }
 0x52f   : >> { %v2584_v30 = vpop.f32.mrb[2].mxu1 }
 0x530   : >> { %v3951_v31 = vpop.f32.mrb[3].mxu1 }
 0x53e   : >> { %v2994_v32 = vpop.f32.mrb[0].mxu0 }
 0x53f   : >> { %v4147_v33 = vadd.f32 %v2994_v32, %v2581_v28  ;;  %v4010_v34 = vpop.f32.mrb[1].mxu0 }
 0x540   : >> { %v2997_v35 = vpop.f32.mrb[2].mxu0 }
 0x541   : >> { %v4148_v36 = vadd.f32 %v2997_v35, %v2584_v30  ;;  %v4011_v37 = vpop.f32.mrb[3].mxu0 }
 0x543   : >> { %v4048_v38 = vpack.c.bf16 %v4148_v36, %v4147_v33 }
 0x545   : >> { %4050 = vmatpush3.bf16.msk.msra.mxu1 %vm4727_vm11, %v4048_v38 }
 0x548   : >> { %4017 = vmatmul.mubr.msk.f32.vlgmr.msra.gmra.mrb[4].mxu1 %vm3009_vm15, %v4747_v24 }
 0x61b   : >> { %v3083_v54 = vpop.f32.mrb[4].mxu1 }
 0x61c   : >> { %v3084_v39 = vadd.f32 %v4752_v25, %v3083_v54  ;;  %v4018_v40 = vpop.f32.mrb[5].mxu1 }
 0x61d   : > { %2258 = sbr.rel (!%p2256_p6) target bundleno = 1049 (0x419), region = 169 }
 0x61e   : >> { %v3087_v41 = vmax.f32 %v3084_v39, 0.0 }
 0x620   : >> { %v3088_v43 = vpack.c.bf16 %v3087_v41, %v3087_v41 }
 0x622   : >> { %v3095_v44 = vsel %vm3093_vm2, %v3088_v43, %v3094_v42 }
 0x623   : >> { %3096 = vst [vmem:[%s3090_s30] sm:$0xf] %v3095_v44 }
 0x624 PF: > { %s20_s13 = sadd.s32 1, %s4296_s13  }
 0x625   : > { %p17_p7 = scmp.ge.s32.totalorder %s20_s13, 4  }
 0x627   :  { %19 = sbr.rel (!%p17_p7) target bundleno = 1 (0x1), region = 180 }

</bundles_post_ra>
